<compile_context>
chip_gen: v7x
topology: tpu7x:2x2x1
jax: 0.10.0
libtpu: 0.0.40
codegen_flags: <defaults>
</compile_context>

<pallas_src>
import functools

import jax
import jax.numpy as jnp
import numpy as np
from jax.experimental import pallas as pl
from jax.experimental.pallas import tpu as pltpu


def lstm_kernel(x_ref, w_ih_ref, w_hh_ref, b_gates_ref, w_out_ref, b_out_ref,
                out_ref, h_all_ref, *, hidden_size, batch, seq_len):
    H, B, T = hidden_size, batch, seq_len

    # --- Hoisted input-to-hidden projection: ONE batched matmul for all
    # timesteps (teacher forcing => all inputs known up front). Bias broadcast
    # happens once here instead of once per step.
    gates_x = (jnp.dot(x_ref[...], w_ih_ref[...],
                       preferred_element_type=jnp.float32)
               + b_gates_ref[...])                       # (T*B, 4H)

    w_hh = w_hh_ref[...]                                 # load once

    # --- Sequential recurrence. T is small & static, so a fully-unrolled
    # Python loop keeps every slice static and gives the scheduler full
    # visibility; only h @ W_hh and the gate nonlinearities stay in the loop.
    h = jnp.zeros((B, H), jnp.float32)
    c = jnp.zeros((B, H), jnp.float32)
    for t in range(T):
        gates = gates_x[t * B:(t + 1) * B, :] + jnp.dot(
            h, w_hh, preferred_element_type=jnp.float32)  # (B, 4H)
        i_g = jax.nn.sigmoid(gates[:, 0 * H:1 * H])
        f_g = jax.nn.sigmoid(gates[:, 1 * H:2 * H])
        g_g = jnp.tanh(gates[:, 2 * H:3 * H])
        o_g = jax.nn.sigmoid(gates[:, 3 * H:4 * H])
        c = f_g * c + i_g * g_g
        h = o_g * jnp.tanh(c)
        h_all_ref[pl.ds(t * B, B), :] = h                # stash h_t

    # --- Deferred output head: one batched fc_out + one softmax pass over all
    # timesteps, written as a single lane-dense (T*B, V) slab.
    logits = (jnp.dot(h_all_ref[...], w_out_ref[...],
                      preferred_element_type=jnp.float32)
              + b_out_ref[...])
    m = jnp.max(logits, axis=-1, keepdims=True)
    e = jnp.exp(logits - m)
    denom = jnp.sum(e, axis=-1, keepdims=True)
    out_ref[...] = (e * pl.reciprocal(denom, approx=False)).astype(out_ref.dtype)


def lstm_forward(features, captions, params):
    B = features.shape[0]
    T = captions.shape[1]
    V = captions.shape[2]
    H = params["w_hh_T"].shape[0]

    # fc_in runs once, outside the kernel, in XLA.
    feat_flat = features.reshape(B, -1).astype(jnp.float32)       # (B, cnn_dim)
    x0 = feat_flat @ params["w_in_T"] + params["b_in"]            # (B, V)

    # Per-timestep inputs, time-major, flattened to (T*B, V):
    #   t == 0 -> fc_in(features); t > 0 -> captions[:, t-1, :]
    cap_tm = jnp.transpose(captions[:, :T - 1, :], (1, 0, 2)).astype(jnp.float32)
    x_all = jnp.concatenate([x0[None], cap_tm], axis=0).reshape(T * B, V)

    out_flat = pl.pallas_call(
        functools.partial(lstm_kernel, hidden_size=H, batch=B, seq_len=T),
        out_shape=jax.ShapeDtypeStruct((T * B, V), jnp.float32),
        in_specs=[pl.BlockSpec(memory_space=pltpu.MemorySpace.VMEM)
                  for _ in range(6)],
        out_specs=pl.BlockSpec(memory_space=pltpu.MemorySpace.VMEM),
        scratch_shapes=[pltpu.VMEM((T * B, H), jnp.float32)],   # all h_t
    )(x_all, params["w_ih_T"], params["w_hh_T"], params["b_gates"],
      params["w_out_T"], params["b_out"])

    # (T*B, V) -> (B, T, V) to match the PyTorch convention.
    return jnp.transpose(out_flat.reshape(T, B, V), (1, 0, 2))


def reference_forward(features, captions, params):
    """Pure-JAX reference mirroring the PyTorch module semantics."""
    B = features.shape[0]
    T = captions.shape[1]
    H = params["w_hh_T"].shape[0]
    x0 = features.reshape(B, -1) @ params["w_in_T"] + params["b_in"]
    h = jnp.zeros((B, H), jnp.float32)
    c = jnp.zeros((B, H), jnp.float32)
    outs = []
    for t in range(T):
        x = x0 if t == 0 else captions[:, t - 1, :]
        gates = x @ params["w_ih_T"] + h @ params["w_hh_T"] + params["b_gates"]
        i_g = jax.nn.sigmoid(gates[:, 0 * H:1 * H])
        f_g = jax.nn.sigmoid(gates[:, 1 * H:2 * H])
        g_g = jnp.tanh(gates[:, 2 * H:3 * H])
        o_g = jax.nn.sigmoid(gates[:, 3 * H:4 * H])
        c = f_g * c + i_g * g_g
        h = o_g * jnp.tanh(c)
        logits = h @ params["w_out_T"] + params["b_out"]
        outs.append(jax.nn.softmax(logits, axis=1))
    return jnp.stack(outs, axis=1)


if __name__ == "__main__":
    # Model hyperparameters (small, synthetic).
    B, C_img, H_img, W_img = 2, 4, 16, 16
    cnn_dim = C_img * H_img * W_img          # 1024
    hidden_size = 128
    vocab_size = 128
    seq_len = 8

    key = jax.random.PRNGKey(0)
    keys = jax.random.split(key, 12)
    s_lstm = 1.0 / np.sqrt(hidden_size)
    s_in = 1.0 / np.sqrt(cnn_dim)
    s_out = 1.0 / np.sqrt(hidden_size)

    # Deterministic parameter init (PyTorch-style uniform ranges), stored
    # pre-transposed for x @ W layout.
    params = {
        "w_in_T":  jax.random.uniform(keys[0], (cnn_dim, vocab_size), jnp.float32, -s_in, s_in),
        "b_in":    jax.random.uniform(keys[1], (1, vocab_size), jnp.float32, -s_in, s_in),
        "w_ih_T":  jax.random.uniform(keys[2], (vocab_size, 4 * hidden_size), jnp.float32, -s_lstm, s_lstm),
        "w_hh_T":  jax.random.uniform(keys[3], (hidden_size, 4 * hidden_size), jnp.float32, -s_lstm, s_lstm),
        "b_gates": (jax.random.uniform(keys[4], (1, 4 * hidden_size), jnp.float32, -s_lstm, s_lstm)
                    + jax.random.uniform(keys[5], (1, 4 * hidden_size), jnp.float32, -s_lstm, s_lstm)),
        "w_out_T": jax.random.uniform(keys[6], (hidden_size, vocab_size), jnp.float32, -s_out, s_out),
        "b_out":   jax.random.uniform(keys[7], (1, vocab_size), jnp.float32, -s_out, s_out),
    }
    # TODO(synk): nn.Embedding / self.embed is never used in forward(), so it is omitted.

    features = jax.random.normal(keys[8], (B, C_img, H_img, W_img), jnp.float32)
    captions = jax.random.normal(keys[9], (B, seq_len, vocab_size), jnp.float32)

    out = lstm_forward(features, captions, params)
    jax.block_until_ready(out)

    ref = reference_forward(features, captions, params)
    np.testing.assert_allclose(np.asarray(out), np.asarray(ref), rtol=1e-5, atol=1e-5)
    assert out.shape == (B, seq_len, vocab_size)

    print("KERNEL_OK")
</pallas_src>

<mosaic_0001>
module attributes {stable_mosaic.version = 11 : i64} {
  func.func @lstm_kernel(%arg0: memref<16x128xf32, #tpu.memory_space<vmem>>, %arg1: memref<128x512xf32, #tpu.memory_space<vmem>>, %arg2: memref<128x512xf32, #tpu.memory_space<vmem>>, %arg3: memref<1x512xf32, #tpu.memory_space<vmem>>, %arg4: memref<128x128xf32, #tpu.memory_space<vmem>>, %arg5: memref<1x128xf32, #tpu.memory_space<vmem>>, %arg6: memref<16x128xf32, #tpu.memory_space<vmem>>, %arg7: memref<16x128xf32, #tpu.memory_space<vmem>>) attributes {dimension_semantics = [], scalar_prefetch = 0 : i64, scratch_operands = 1 : i64, tpu.core_type = #tpu.core_type<tc>} {
    %c0 = arith.constant 0 : index
    %c0_0 = arith.constant 0 : index
    %0 = vector.load %arg0[%c0, %c0_0] : memref<16x128xf32, #tpu.memory_space<vmem>>, vector<16x128xf32>
    %c0_1 = arith.constant 0 : index
    %c0_2 = arith.constant 0 : index
    %1 = vector.load %arg1[%c0_1, %c0_2] : memref<128x512xf32, #tpu.memory_space<vmem>>, vector<128x512xf32>
    %cst = arith.constant dense<0.000000e+00> : vector<16x512xf32>
    %2 = tpu.matmul %0, %1, %cst {dimension_numbers = #tpu.dot_dimension_numbers<[1], [0], [0], [1], [0, 0, 1, 1], [], []>} : vector<16x128xf32>, vector<128x512xf32>, vector<16x512xf32> -> vector<16x512xf32>
    %c0_3 = arith.constant 0 : index
    %c0_4 = arith.constant 0 : index
    %3 = vector.load %arg3[%c0_3, %c0_4] : memref<1x512xf32, #tpu.memory_space<vmem>>, vector<1x512xf32>
    %4 = vector.broadcast %3 : vector<1x512xf32> to vector<16x512xf32>
    %5 = arith.addf %2, %4 : vector<16x512xf32>
    %c0_5 = arith.constant 0 : index
    %c0_6 = arith.constant 0 : index
    %6 = vector.load %arg2[%c0_5, %c0_6] : memref<128x512xf32, #tpu.memory_space<vmem>>, vector<128x512xf32>
    %cst_7 = arith.constant 0.000000e+00 : f32
    %7 = vector.broadcast %cst_7 : f32 to vector<2x128xf32>
    %cst_8 = arith.constant 0.000000e+00 : f32
    %8 = vector.broadcast %cst_8 : f32 to vector<2x128xf32>
    %9 = vector.extract_strided_slice %5 {offsets = [0, 0], sizes = [2, 512], strides = [1, 1]} : vector<16x512xf32> to vector<2x512xf32>
    %cst_9 = arith.constant dense<0.000000e+00> : vector<2x512xf32>
    %10 = tpu.matmul %7, %6, %cst_9 {dimension_numbers = #tpu.dot_dimension_numbers<[1], [0], [0], [1], [0, 0, 1, 1], [], []>} : vector<2x128xf32>, vector<128x512xf32>, vector<2x512xf32> -> vector<2x512xf32>
    %11 = arith.addf %9, %10 : vector<2x512xf32>
    %12 = vector.extract_strided_slice %11 {offsets = [0, 0], sizes = [2, 128], strides = [1, 1]} : vector<2x512xf32> to vector<2x128xf32>
    %13 = arith.negf %12 : vector<2x128xf32>
    %14 = math.exp %13 : vector<2x128xf32>
    %cst_10 = arith.constant 1.000000e+00 : f32
    %15 = vector.broadcast %cst_10 : f32 to vector<2x128xf32>
    %16 = arith.addf %15, %14 : vector<2x128xf32>
    %17 = arith.divf %15, %16 : vector<2x128xf32>
    %18 = vector.extract_strided_slice %11 {offsets = [0, 128], sizes = [2, 128], strides = [1, 1]} : vector<2x512xf32> to vector<2x128xf32>
    %19 = arith.negf %18 : vector<2x128xf32>
    %20 = math.exp %19 : vector<2x128xf32>
    %cst_11 = arith.constant 1.000000e+00 : f32
    %21 = vector.broadcast %cst_11 : f32 to vector<2x128xf32>
    %22 = arith.addf %21, %20 : vector<2x128xf32>
    %23 = arith.divf %21, %22 : vector<2x128xf32>
    %24 = vector.extract_strided_slice %11 {offsets = [0, 256], sizes = [2, 128], strides = [1, 1]} : vector<2x512xf32> to vector<2x128xf32>
    %25 = math.tanh %24 : vector<2x128xf32>
    %26 = vector.extract_strided_slice %11 {offsets = [0, 384], sizes = [2, 128], strides = [1, 1]} : vector<2x512xf32> to vector<2x128xf32>
    %27 = arith.negf %26 : vector<2x128xf32>
    %28 = math.exp %27 : vector<2x128xf32>
    %cst_12 = arith.constant 1.000000e+00 : f32
    %29 = vector.broadcast %cst_12 : f32 to vector<2x128xf32>
    %30 = arith.addf %29, %28 : vector<2x128xf32>
    %31 = arith.divf %29, %30 : vector<2x128xf32>
    %32 = arith.mulf %23, %8 : vector<2x128xf32>
    %33 = arith.mulf %17, %25 : vector<2x128xf32>
    %34 = arith.addf %32, %33 : vector<2x128xf32>
    %35 = math.tanh %34 : vector<2x128xf32>
    %36 = arith.mulf %31, %35 : vector<2x128xf32>
    %c0_13 = arith.constant 0 : index
    %c0_14 = arith.constant 0 : index
    %37 = vector.load %arg7[%c0_13, %c0_14] : memref<16x128xf32, #tpu.memory_space<vmem>>, vector<2x128xf32>
    tpu.vector_store %arg7[%c0_13, %c0_14], %36 {strides = array<i32>} : memref<16x128xf32, #tpu.memory_space<vmem>>, vector<2x128xf32>,
    %38 = vector.extract_strided_slice %5 {offsets = [2, 0], sizes = [2, 512], strides = [1, 1]} : vector<16x512xf32> to vector<2x512xf32>
    %cst_15 = arith.constant dense<0.000000e+00> : vector<2x512xf32>
    %39 = tpu.matmul %36, %6, %cst_15 {dimension_numbers = #tpu.dot_dimension_numbers<[1], [0], [0], [1], [0, 0, 1, 1], [], []>} : vector<2x128xf32>, vector<128x512xf32>, vector<2x512xf32> -> vector<2x512xf32>
    %40 = arith.addf %38, %39 : vector<2x512xf32>
    %41 = vector.extract_strided_slice %40 {offsets = [0, 0], sizes = [2, 128], strides = [1, 1]} : vector<2x512xf32> to vector<2x128xf32>
    %42 = arith.negf %41 : vector<2x128xf32>
    %43 = math.exp %42 : vector<2x128xf32>
    %cst_16 = arith.constant 1.000000e+00 : f32
    %44 = vector.broadcast %cst_16 : f32 to vector<2x128xf32>
    %45 = arith.addf %44, %43 : vector<2x128xf32>
    %46 = arith.divf %44, %45 : vector<2x128xf32>
    %47 = vector.extract_strided_slice %40 {offsets = [0, 128], sizes = [2, 128], strides = [1, 1]} : vector<2x512xf32> to vector<2x128xf32>
    %48 = arith.negf %47 : vector<2x128xf32>
    %49 = math.exp %48 : vector<2x128xf32>
    %cst_17 = arith.constant 1.000000e+00 : f32
    %50 = vector.broadcast %cst_17 : f32 to vector<2x128xf32>
    %51 = arith.addf %50, %49 : vector<2x128xf32>
    %52 = arith.divf %50, %51 : vector<2x128xf32>
    %53 = vector.extract_strided_slice %40 {offsets = [0, 256], sizes = [2, 128], strides = [1, 1]} : vector<2x512xf32> to vector<2x128xf32>
    %54 = math.tanh %53 : vector<2x128xf32>
    %55 = vector.extract_strided_slice %40 {offsets = [0, 384], sizes = [2, 128], strides = [1, 1]} : vector<2x512xf32> to vector<2x128xf32>
    %56 = arith.negf %55 : vector<2x128xf32>
    %57 = math.exp %56 : vector<2x128xf32>
    %cst_18 = arith.constant 1.000000e+00 : f32
    %58 = vector.broadcast %cst_18 : f32 to vector<2x128xf32>
    %59 = arith.addf %58, %57 : vector<2x128xf32>
    %60 = arith.divf %58, %59 : vector<2x128xf32>
    %61 = arith.mulf %52, %34 : vector<2x128xf32>
    %62 = arith.mulf %46, %54 : vector<2x128xf32>
    %63 = arith.addf %61, %62 : vector<2x128xf32>
    %64 = math.tanh %63 : vector<2x128xf32>
    %65 = arith.mulf %60, %64 : vector<2x128xf32>
    %c2 = arith.constant 2 : index
    %c0_19 = arith.constant 0 : index
    %66 = vector.load %arg7[%c2, %c0_19] : memref<16x128xf32, #tpu.memory_space<vmem>>, vector<2x128xf32>
    tpu.vector_store %arg7[%c2, %c0_19], %65 {strides = array<i32>} : memref<16x128xf32, #tpu.memory_space<vmem>>, vector<2x128xf32>,
    %67 = vector.extract_strided_slice %5 {offsets = [4, 0], sizes = [2, 512], strides = [1, 1]} : vector<16x512xf32> to vector<2x512xf32>
    %cst_20 = arith.constant dense<0.000000e+00> : vector<2x512xf32>
    %68 = tpu.matmul %65, %6, %cst_20 {dimension_numbers = #tpu.dot_dimension_numbers<[1], [0], [0], [1], [0, 0, 1, 1], [], []>} : vector<2x128xf32>, vector<128x512xf32>, vector<2x512xf32> -> vector<2x512xf32>
    %69 = arith.addf %67, %68 : vector<2x512xf32>
    %70 = vector.extract_strided_slice %69 {offsets = [0, 0], sizes = [2, 128], strides = [1, 1]} : vector<2x512xf32> to vector<2x128xf32>
    %71 = arith.negf %70 : vector<2x128xf32>
    %72 = math.exp %71 : vector<2x128xf32>
    %cst_21 = arith.constant 1.000000e+00 : f32
    %73 = vector.broadcast %cst_21 : f32 to vector<2x128xf32>
    %74 = arith.addf %73, %72 : vector<2x128xf32>
    %75 = arith.divf %73, %74 : vector<2x128xf32>
    %76 = vector.extract_strided_slice %69 {offsets = [0, 128], sizes = [2, 128], strides = [1, 1]} : vector<2x512xf32> to vector<2x128xf32>
    %77 = arith.negf %76 : vector<2x128xf32>
    %78 = math.exp %77 : vector<2x128xf32>
    %cst_22 = arith.constant 1.000000e+00 : f32
    %79 = vector.broadcast %cst_22 : f32 to vector<2x128xf32>
    %80 = arith.addf %79, %78 : vector<2x128xf32>
    %81 = arith.divf %79, %80 : vector<2x128xf32>
    %82 = vector.extract_strided_slice %69 {offsets = [0, 256], sizes = [2, 128], strides = [1, 1]} : vector<2x512xf32> to vector<2x128xf32>
    %83 = math.tanh %82 : vector<2x128xf32>
    %84 = vector.extract_strided_slice %69 {offsets = [0, 384], sizes = [2, 128], strides = [1, 1]} : vector<2x512xf32> to vector<2x128xf32>
    %85 = arith.negf %84 : vector<2x128xf32>
    %86 = math.exp %85 : vector<2x128xf32>
    %cst_23 = arith.constant 1.000000e+00 : f32
    %87 = vector.broadcast %cst_23 : f32 to vector<2x128xf32>
    %88 = arith.addf %87, %86 : vector<2x128xf32>
    %89 = arith.divf %87, %88 : vector<2x128xf32>
    %90 = arith.mulf %81, %63 : vector<2x128xf32>
    %91 = arith.mulf %75, %83 : vector<2x128xf32>
    %92 = arith.addf %90, %91 : vector<2x128xf32>
    %93 = math.tanh %92 : vector<2x128xf32>
    %94 = arith.mulf %89, %93 : vector<2x128xf32>
    %c4 = arith.constant 4 : index
    %c0_24 = arith.constant 0 : index
    %95 = vector.load %arg7[%c4, %c0_24] : memref<16x128xf32, #tpu.memory_space<vmem>>, vector<2x128xf32>
    tpu.vector_store %arg7[%c4, %c0_24], %94 {strides = array<i32>} : memref<16x128xf32, #tpu.memory_space<vmem>>, vector<2x128xf32>,
    %96 = vector.extract_strided_slice %5 {offsets = [6, 0], sizes = [2, 512], strides = [1, 1]} : vector<16x512xf32> to vector<2x512xf32>
    %cst_25 = arith.constant dense<0.000000e+00> : vector<2x512xf32>
    %97 = tpu.matmul %94, %6, %cst_25 {dimension_numbers = #tpu.dot_dimension_numbers<[1], [0], [0], [1], [0, 0, 1, 1], [], []>} : vector<2x128xf32>, vector<128x512xf32>, vector<2x512xf32> -> vector<2x512xf32>
    %98 = arith.addf %96, %97 : vector<2x512xf32>
    %99 = vector.extract_strided_slice %98 {offsets = [0, 0], sizes = [2, 128], strides = [1, 1]} : vector<2x512xf32> to vector<2x128xf32>
    %100 = arith.negf %99 : vector<2x128xf32>
    %101 = math.exp %100 : vector<2x128xf32>
    %cst_26 = arith.constant 1.000000e+00 : f32
    %102 = vector.broadcast %cst_26 : f32 to vector<2x128xf32>
    %103 = arith.addf %102, %101 : vector<2x128xf32>
    %104 = arith.divf %102, %103 : vector<2x128xf32>
    %105 = vector.extract_strided_slice %98 {offsets = [0, 128], sizes = [2, 128], strides = [1, 1]} : vector<2x512xf32> to vector<2x128xf32>
    %106 = arith.negf %105 : vector<2x128xf32>
    %107 = math.exp %106 : vector<2x128xf32>
    %cst_27 = arith.constant 1.000000e+00 : f32
    %108 = vector.broadcast %cst_27 : f32 to vector<2x128xf32>
    %109 = arith.addf %108, %107 : vector<2x128xf32>
    %110 = arith.divf %108, %109 : vector<2x128xf32>
    %111 = vector.extract_strided_slice %98 {offsets = [0, 256], sizes = [2, 128], strides = [1, 1]} : vector<2x512xf32> to vector<2x128xf32>
    %112 = math.tanh %111 : vector<2x128xf32>
    %113 = vector.extract_strided_slice %98 {offsets = [0, 384], sizes = [2, 128], strides = [1, 1]} : vector<2x512xf32> to vector<2x128xf32>
    %114 = arith.negf %113 : vector<2x128xf32>
    %115 = math.exp %114 : vector<2x128xf32>
    %cst_28 = arith.constant 1.000000e+00 : f32
    %116 = vector.broadcast %cst_28 : f32 to vector<2x128xf32>
    %117 = arith.addf %116, %115 : vector<2x128xf32>
    %118 = arith.divf %116, %117 : vector<2x128xf32>
    %119 = arith.mulf %110, %92 : vector<2x128xf32>
    %120 = arith.mulf %104, %112 : vector<2x128xf32>
    %121 = arith.addf %119, %120 : vector<2x128xf32>
    %122 = math.tanh %121 : vector<2x128xf32>
    %123 = arith.mulf %118, %122 : vector<2x128xf32>
    %c6 = arith.constant 6 : index
    %c0_29 = arith.constant 0 : index
    %124 = vector.load %arg7[%c6, %c0_29] : memref<16x128xf32, #tpu.memory_space<vmem>>, vector<2x128xf32>
    tpu.vector_store %arg7[%c6, %c0_29], %123 {strides = array<i32>} : memref<16x128xf32, #tpu.memory_space<vmem>>, vector<2x128xf32>,
    %125 = vector.extract_strided_slice %5 {offsets = [8, 0], sizes = [2, 512], strides = [1, 1]} : vector<16x512xf32> to vector<2x512xf32>
    %cst_30 = arith.constant dense<0.000000e+00> : vector<2x512xf32>
    %126 = tpu.matmul %123, %6, %cst_30 {dimension_numbers = #tpu.dot_dimension_numbers<[1], [0], [0], [1], [0, 0, 1, 1], [], []>} : vector<2x128xf32>, vector<128x512xf32>, vector<2x512xf32> -> vector<2x512xf32>
    %127 = arith.addf %125, %126 : vector<2x512xf32>
    %128 = vector.extract_strided_slice %127 {offsets = [0, 0], sizes = [2, 128], strides = [1, 1]} : vector<2x512xf32> to vector<2x128xf32>
    %129 = arith.negf %128 : vector<2x128xf32>
    %130 = math.exp %129 : vector<2x128xf32>
    %cst_31 = arith.constant 1.000000e+00 : f32
    %131 = vector.broadcast %cst_31 : f32 to vector<2x128xf32>
    %132 = arith.addf %131, %130 : vector<2x128xf32>
    %133 = arith.divf %131, %132 : vector<2x128xf32>
    %134 = vector.extract_strided_slice %127 {offsets = [0, 128], sizes = [2, 128], strides = [1, 1]} : vector<2x512xf32> to vector<2x128xf32>
    %135 = arith.negf %134 : vector<2x128xf32>
    %136 = math.exp %135 : vector<2x128xf32>
    %cst_32 = arith.constant 1.000000e+00 : f32
    %137 = vector.broadcast %cst_32 : f32 to vector<2x128xf32>
    %138 = arith.addf %137, %136 : vector<2x128xf32>
    %139 = arith.divf %137, %138 : vector<2x128xf32>
    %140 = vector.extract_strided_slice %127 {offsets = [0, 256], sizes = [2, 128], strides = [1, 1]} : vector<2x512xf32> to vector<2x128xf32>
    %141 = math.tanh %140 : vector<2x128xf32>
    %142 = vector.extract_strided_slice %127 {offsets = [0, 384], sizes = [2, 128], strides = [1, 1]} : vector<2x512xf32> to vector<2x128xf32>
    %143 = arith.negf %142 : vector<2x128xf32>
    %144 = math.exp %143 : vector<2x128xf32>
    %cst_33 = arith.constant 1.000000e+00 : f32
    %145 = vector.broadcast %cst_33 : f32 to vector<2x128xf32>
    %146 = arith.addf %145, %144 : vector<2x128xf32>
    %147 = arith.divf %145, %146 : vector<2x128xf32>
    %148 = arith.mulf %139, %121 : vector<2x128xf32>
    %149 = arith.mulf %133, %141 : vector<2x128xf32>
    %150 = arith.addf %148, %149 : vector<2x128xf32>
    %151 = math.tanh %150 : vector<2x128xf32>
    %152 = arith.mulf %147, %151 : vector<2x128xf32>
    %c8 = arith.constant 8 : index
    %c0_34 = arith.constant 0 : index
    %153 = vector.load %arg7[%c8, %c0_34] : memref<16x128xf32, #tpu.memory_space<vmem>>, vector<2x128xf32>
    tpu.vector_store %arg7[%c8, %c0_34], %152 {strides = array<i32>} : memref<16x128xf32, #tpu.memory_space<vmem>>, vector<2x128xf32>,
    %154 = vector.extract_strided_slice %5 {offsets = [10, 0], sizes = [2, 512], strides = [1, 1]} : vector<16x512xf32> to vector<2x512xf32>
    %cst_35 = arith.constant dense<0.000000e+00> : vector<2x512xf32>
    %155 = tpu.matmul %152, %6, %cst_35 {dimension_numbers = #tpu.dot_dimension_numbers<[1], [0], [0], [1], [0, 0, 1, 1], [], []>} : vector<2x128xf32>, vector<128x512xf32>, vector<2x512xf32> -> vector<2x512xf32>
    %156 = arith.addf %154, %155 : vector<2x512xf32>
    %157 = vector.extract_strided_slice %156 {offsets = [0, 0], sizes = [2, 128], strides = [1, 1]} : vector<2x512xf32> to vector<2x128xf32>
    %158 = arith.negf %157 : vector<2x128xf32>
    %159 = math.exp %158 : vector<2x128xf32>
    %cst_36 = arith.constant 1.000000e+00 : f32
    %160 = vector.broadcast %cst_36 : f32 to vector<2x128xf32>
    %161 = arith.addf %160, %159 : vector<2x128xf32>
    %162 = arith.divf %160, %161 : vector<2x128xf32>
    %163 = vector.extract_strided_slice %156 {offsets = [0, 128], sizes = [2, 128], strides = [1, 1]} : vector<2x512xf32> to vector<2x128xf32>
    %164 = arith.negf %163 : vector<2x128xf32>
    %165 = math.exp %164 : vector<2x128xf32>
    %cst_37 = arith.constant 1.000000e+00 : f32
    %166 = vector.broadcast %cst_37 : f32 to vector<2x128xf32>
    %167 = arith.addf %166, %165 : vector<2x128xf32>
    %168 = arith.divf %166, %167 : vector<2x128xf32>
    %169 = vector.extract_strided_slice %156 {offsets = [0, 256], sizes = [2, 128], strides = [1, 1]} : vector<2x512xf32> to vector<2x128xf32>
    %170 = math.tanh %169 : vector<2x128xf32>
    %171 = vector.extract_strided_slice %156 {offsets = [0, 384], sizes = [2, 128], strides = [1, 1]} : vector<2x512xf32> to vector<2x128xf32>
    %172 = arith.negf %171 : vector<2x128xf32>
    %173 = math.exp %172 : vector<2x128xf32>
    %cst_38 = arith.constant 1.000000e+00 : f32
    %174 = vector.broadcast %cst_38 : f32 to vector<2x128xf32>
    %175 = arith.addf %174, %173 : vector<2x128xf32>
    %176 = arith.divf %174, %175 : vector<2x128xf32>
    %177 = arith.mulf %168, %150 : vector<2x128xf32>
    %178 = arith.mulf %162, %170 : vector<2x128xf32>
    %179 = arith.addf %177, %178 : vector<2x128xf32>
    %180 = math.tanh %179 : vector<2x128xf32>
    %181 = arith.mulf %176, %180 : vector<2x128xf32>
    %c10 = arith.constant 10 : index
    %c0_39 = arith.constant 0 : index
    %182 = vector.load %arg7[%c10, %c0_39] : memref<16x128xf32, #tpu.memory_space<vmem>>, vector<2x128xf32>
    tpu.vector_store %arg7[%c10, %c0_39], %181 {strides = array<i32>} : memref<16x128xf32, #tpu.memory_space<vmem>>, vector<2x128xf32>,
    %183 = vector.extract_strided_slice %5 {offsets = [12, 0], sizes = [2, 512], strides = [1, 1]} : vector<16x512xf32> to vector<2x512xf32>
    %cst_40 = arith.constant dense<0.000000e+00> : vector<2x512xf32>
    %184 = tpu.matmul %181, %6, %cst_40 {dimension_numbers = #tpu.dot_dimension_numbers<[1], [0], [0], [1], [0, 0, 1, 1], [], []>} : vector<2x128xf32>, vector<128x512xf32>, vector<2x512xf32> -> vector<2x512xf32>
    %185 = arith.addf %183, %184 : vector<2x512xf32>
    %186 = vector.extract_strided_slice %185 {offsets = [0, 0], sizes = [2, 128], strides = [1, 1]} : vector<2x512xf32> to vector<2x128xf32>
    %187 = arith.negf %186 : vector<2x128xf32>
    %188 = math.exp %187 : vector<2x128xf32>
    %cst_41 = arith.constant 1.000000e+00 : f32
    %189 = vector.broadcast %cst_41 : f32 to vector<2x128xf32>
    %190 = arith.addf %189, %188 : vector<2x128xf32>
    %191 = arith.divf %189, %190 : vector<2x128xf32>
    %192 = vector.extract_strided_slice %185 {offsets = [0, 128], sizes = [2, 128], strides = [1, 1]} : vector<2x512xf32> to vector<2x128xf32>
    %193 = arith.negf %192 : vector<2x128xf32>
    %194 = math.exp %193 : vector<2x128xf32>
    %cst_42 = arith.constant 1.000000e+00 : f32
    %195 = vector.broadcast %cst_42 : f32 to vector<2x128xf32>
    %196 = arith.addf %195, %194 : vector<2x128xf32>
    %197 = arith.divf %195, %196 : vector<2x128xf32>
    %198 = vector.extract_strided_slice %185 {offsets = [0, 256], sizes = [2, 128], strides = [1, 1]} : vector<2x512xf32> to vector<2x128xf32>
    %199 = math.tanh %198 : vector<2x128xf32>
    %200 = vector.extract_strided_slice %185 {offsets = [0, 384], sizes = [2, 128], strides = [1, 1]} : vector<2x512xf32> to vector<2x128xf32>
    %201 = arith.negf %200 : vector<2x128xf32>
    %202 = math.exp %201 : vector<2x128xf32>
    %cst_43 = arith.constant 1.000000e+00 : f32
    %203 = vector.broadcast %cst_43 : f32 to vector<2x128xf32>
    %204 = arith.addf %203, %202 : vector<2x128xf32>
    %205 = arith.divf %203, %204 : vector<2x128xf32>
    %206 = arith.mulf %197, %179 : vector<2x128xf32>
    %207 = arith.mulf %191, %199 : vector<2x128xf32>
    %208 = arith.addf %206, %207 : vector<2x128xf32>
    %209 = math.tanh %208 : vector<2x128xf32>
    %210 = arith.mulf %205, %209 : vector<2x128xf32>
    %c12 = arith.constant 12 : index
    %c0_44 = arith.constant 0 : index
    %211 = vector.load %arg7[%c12, %c0_44] : memref<16x128xf32, #tpu.memory_space<vmem>>, vector<2x128xf32>
    tpu.vector_store %arg7[%c12, %c0_44], %210 {strides = array<i32>} : memref<16x128xf32, #tpu.memory_space<vmem>>, vector<2x128xf32>,
    %212 = vector.extract_strided_slice %5 {offsets = [14, 0], sizes = [2, 512], strides = [1, 1]} : vector<16x512xf32> to vector<2x512xf32>
    %cst_45 = arith.constant dense<0.000000e+00> : vector<2x512xf32>
    %213 = tpu.matmul %210, %6, %cst_45 {dimension_numbers = #tpu.dot_dimension_numbers<[1], [0], [0], [1], [0, 0, 1, 1], [], []>} : vector<2x128xf32>, vector<128x512xf32>, vector<2x512xf32> -> vector<2x512xf32>
    %214 = arith.addf %212, %213 : vector<2x512xf32>
    %215 = vector.extract_strided_slice %214 {offsets = [0, 0], sizes = [2, 128], strides = [1, 1]} : vector<2x512xf32> to vector<2x128xf32>
    %216 = arith.negf %215 : vector<2x128xf32>
    %217 = math.exp %216 : vector<2x128xf32>
    %cst_46 = arith.constant 1.000000e+00 : f32
    %218 = vector.broadcast %cst_46 : f32 to vector<2x128xf32>
    %219 = arith.addf %218, %217 : vector<2x128xf32>
    %220 = arith.divf %218, %219 : vector<2x128xf32>
    %221 = vector.extract_strided_slice %214 {offsets = [0, 128], sizes = [2, 128], strides = [1, 1]} : vector<2x512xf32> to vector<2x128xf32>
    %222 = arith.negf %221 : vector<2x128xf32>
    %223 = math.exp %222 : vector<2x128xf32>
    %cst_47 = arith.constant 1.000000e+00 : f32
    %224 = vector.broadcast %cst_47 : f32 to vector<2x128xf32>
    %225 = arith.addf %224, %223 : vector<2x128xf32>
    %226 = arith.divf %224, %225 : vector<2x128xf32>
    %227 = vector.extract_strided_slice %214 {offsets = [0, 256], sizes = [2, 128], strides = [1, 1]} : vector<2x512xf32> to vector<2x128xf32>
    %228 = math.tanh %227 : vector<2x128xf32>
    %229 = vector.extract_strided_slice %214 {offsets = [0, 384], sizes = [2, 128], strides = [1, 1]} : vector<2x512xf32> to vector<2x128xf32>
    %230 = arith.negf %229 : vector<2x128xf32>
    %231 = math.exp %230 : vector<2x128xf32>
    %cst_48 = arith.constant 1.000000e+00 : f32
    %232 = vector.broadcast %cst_48 : f32 to vector<2x128xf32>
    %233 = arith.addf %232, %231 : vector<2x128xf32>
    %234 = arith.divf %232, %233 : vector<2x128xf32>
    %235 = arith.mulf %226, %208 : vector<2x128xf32>
    %236 = arith.mulf %220, %228 : vector<2x128xf32>
    %237 = arith.addf %235, %236 : vector<2x128xf32>
    %238 = math.tanh %237 : vector<2x128xf32>
    %239 = arith.mulf %234, %238 : vector<2x128xf32>
    %c14 = arith.constant 14 : index
    %c0_49 = arith.constant 0 : index
    %240 = vector.load %arg7[%c14, %c0_49] : memref<16x128xf32, #tpu.memory_space<vmem>>, vector<2x128xf32>
    tpu.vector_store %arg7[%c14, %c0_49], %239 {strides = array<i32>} : memref<16x128xf32, #tpu.memory_space<vmem>>, vector<2x128xf32>,
    %c0_50 = arith.constant 0 : index
    %c0_51 = arith.constant 0 : index
    %241 = vector.load %arg7[%c0_50, %c0_51] : memref<16x128xf32, #tpu.memory_space<vmem>>, vector<16x128xf32>
    %c0_52 = arith.constant 0 : index
    %c0_53 = arith.constant 0 : index
    %242 = vector.load %arg4[%c0_52, %c0_53] : memref<128x128xf32, #tpu.memory_space<vmem>>, vector<128x128xf32>
    %cst_54 = arith.constant dense<0.000000e+00> : vector<16x128xf32>
    %243 = tpu.matmul %241, %242, %cst_54 {dimension_numbers = #tpu.dot_dimension_numbers<[1], [0], [0], [1], [0, 0, 1, 1], [], []>} : vector<16x128xf32>, vector<128x128xf32>, vector<16x128xf32> -> vector<16x128xf32>
    %c0_55 = arith.constant 0 : index
    %c0_56 = arith.constant 0 : index
    %244 = vector.load %arg5[%c0_55, %c0_56] : memref<1x128xf32, #tpu.memory_space<vmem>>, vector<1x128xf32>
    %245 = vector.broadcast %244 : vector<1x128xf32> to vector<16x128xf32>
    %246 = arith.addf %243, %245 : vector<16x128xf32>
    %cst_57 = arith.constant dense<0xFF800000> : vector<16xf32>
    %247 = vector.multi_reduction <maximumf>, %246, %cst_57 [1] : vector<16x128xf32> to vector<16xf32>
    %248 = vector.shape_cast %247 : vector<16xf32> to vector<16x1xf32>
    %249 = vector.broadcast %248 : vector<16x1xf32> to vector<16x128xf32>
    %250 = arith.subf %246, %249 : vector<16x128xf32>
    %251 = math.exp %250 : vector<16x128xf32>
    %cst_58 = arith.constant dense<0.000000e+00> : vector<16xf32>
    %252 = vector.multi_reduction <add>, %251, %cst_58 [1] : vector<16x128xf32> to vector<16xf32>
    %253 = vector.shape_cast %252 : vector<16xf32> to vector<16x1xf32>
    %254 = tpu.reciprocal %253 : vector<16x1xf32> -> vector<16x1xf32>
    %255 = vector.broadcast %254 : vector<16x1xf32> to vector<16x128xf32>
    %256 = arith.mulf %251, %255 : vector<16x128xf32>
    %c0_59 = arith.constant 0 : index
    %c0_60 = arith.constant 0 : index
    %257 = vector.load %arg6[%c0_59, %c0_60] : memref<16x128xf32, #tpu.memory_space<vmem>>, vector<16x128xf32>
    tpu.vector_store %arg6[%c0_59, %c0_60], %256 {strides = array<i32>} : memref<16x128xf32, #tpu.memory_space<vmem>>, vector<16x128xf32>,
    return
  }
}

</mosaic_0001>

<bundles_post_ra>
// kernel: tpu_custom_call.1
= control target key start
LH: loop header
LB: loop body
LE: loop exit
PB: predicated region body
PF: predicated region fallthrough
CT: control target
= control target key end

     0   :  { %11 = vsyncpa [#allocation4], 0  ;;  %s3501_s0 = inlined_call_operand.hbm [shape: f32[16,128], index: 0, kind: input, shape index: {}]   ;;  %s3502_s1 = inlined_call_operand.hbm [shape: f32[128,512], index: 1, kind: input, shape index: {}]   ;;  %s3503_s2 = inlined_call_operand.hbm [shape: f32[128,512], index: 2, kind: input, shape index: {}]   ;;  %s3504_s3 = inlined_call_operand.vmem [shape: f32[1,512], index: 3, kind: input, shape index: {}]   ;;  %s3505_s4 = inlined_call_operand.hbm [shape: f32[128,128], index: 4, kind: input, shape index: {}]   ;;  %s3506_s5 = inlined_call_operand.vmem [shape: f32[1,128], index: 5, kind: input, shape index: {}]   ;;  %s3507_s6 = inlined_call_operand.hbm [shape: f32[16,128], index: 6, kind: output, shape index: {}]  }
   0x1   :  { %12 = vsyncpa [#allocation7], 0 }
   0x2   :  { %13 = vsyncpa [#allocation10], 0 }
   0x3   :  { %14 = vsyncpa [#allocation5], 0  ;;  %s2950_s21 = smov [#allocation6]   ;;  %s2832_s25 = scalar_lea.hbm %s3502_s1, 8192 }
   0x4   :  { %s32_s22 = sshll.u32 %s2950_s21, 4  ;;  %p2833_p0 = scmp.ne.s32.totalorder %s3502_s1, %s2832_s25  ;;  %s33_s22 = int_to_ptr.vmem [resolvable:$true] %s32_s22 }
   0x5   :  { %p2836_p1 = scmp.lt.u32.totalorder %s2832_s25, %s3502_s1 }
   0x7   :  { %p2838_p2 = pnand %p2836_p1, %p2833_p0 }
   0x9   :  { %2841 = shalt.err (!%p2838_p2)
}
   0xa   :  { %s2842_s30 = scalar_lea.vmem %s33_s22, 8192  ;;  %p2847_p4 = scmp.lt.s32.totalorder %s33_s22, %s33_s22 }
   0xb   :  { %p2843_p3 = scmp.ne.s32.totalorder %s33_s22, %s2842_s30  ;;  %p2848_p5 = scmp.lt.s32.totalorder %s2842_s30, %s2842_s30 }
   0xd   :  { %p2849_p6 = por %p2848_p5, %p2847_p4 }
   0xf   :  { %p2850_p7 = pnand %p2849_p6, %p2843_p3 }
  0x11   :  { %2853 = shalt.err (!%p2850_p7)
}
  0x12   :  { %s2951_s7 = smov 512   ;;  %s2952_s8 = smov 32  }
  0x13   :  { %38 = dma.hbm_to_vmem [thread:$0]  %s3502_s1, 8192, %s33_s22, [#allocation7], %s2951_s7, %s2951_s7, %s2952_s8  }
  0x14   :  { %s2953_s11 = smov [#allocation3]   ;;  %s2854_s15 = scalar_lea.hbm %s3501_s0, 256 }
  0x15   :  { %s20_s12 = sshll.u32 %s2953_s11, 4  ;;  %p2855_p8 = scmp.ne.s32.totalorder %s3501_s0, %s2854_s15  ;;  %s21_s12 = int_to_ptr.vmem [resolvable:$true] %s20_s12 }
  0x16   :  { %p2858_p9 = scmp.lt.u32.totalorder %s2854_s15, %s3501_s0 }
  0x18   :  { %p2860_p10 = pnand %p2858_p9, %p2855_p8 }
  0x1a   :  { %2863 = shalt.err (!%p2860_p10)
}
  0x1b   :  { %s2864_s20 = scalar_lea.vmem %s21_s12, 256  ;;  %p2869_p12 = scmp.lt.s32.totalorder %s21_s12, %s21_s12 }
  0x1c   :  { %p2865_p11 = scmp.ne.s32.totalorder %s21_s12, %s2864_s20  ;;  %p2870_p13 = scmp.lt.s32.totalorder %s2864_s20, %s2864_s20 }
  0x1e   :  { %p2871_p0 = por %p2870_p13, %p2869_p12 }
  0x20   :  { %p2872_p1 = pnand %p2871_p0, %p2865_p11 }
  0x22   :  { %2875 = shalt.err (!%p2872_p1)
}
  0x23   :  { %s2954_s1 = smov 128   ;;  %s2955_s21 = smov 8  }
  0x24   :  { %26 = dma.hbm_to_vmem [thread:$0]  %s3501_s0, 256, %s21_s12, [#allocation4], %s2954_s1, %s2954_s1, %s2955_s21  }
  0x25   :  { %s2956_s24 = smov [#allocation8]   ;;  %s2957_s26 = smov [#allocation9]  }
  0x26   :  { %s44_s25 = sshll.u32 %s2956_s24, 4  ;;  %s58_s27 = sshll.u32 %s2957_s26, 4  ;;  %s45_s25 = int_to_ptr.vmem [resolvable:$true] %s44_s25  ;;  %s3025_s27 = int_to_ptr.vmem [resolvable:$true] %s58_s27 }
  0x27   :  { %s2876_s30 = scalar_lea.hbm %s3503_s2, 8192 }
  0x28   :  { %p2877_p2 = scmp.ne.s32.totalorder %s3503_s2, %s2876_s30  ;;  %p2880_p3 = scmp.lt.u32.totalorder %s2876_s30, %s3503_s2 }
  0x2a   :  { %p2882_p4 = pnand %p2880_p3, %p2877_p2 }
  0x2c   :  { %2885 = shalt.err (!%p2882_p4)
}
  0x2d   :  { %s2886_s0 = scalar_lea.vmem %s45_s25, 8192  ;;  %p2891_p6 = scmp.lt.s32.totalorder %s45_s25, %s45_s25 }
  0x2e   :  { %p2887_p5 = scmp.ne.s32.totalorder %s45_s25, %s2886_s0  ;;  %p2892_p7 = scmp.lt.s32.totalorder %s2886_s0, %s2886_s0 }
  0x30   :  { %p2893_p8 = por %p2892_p7, %p2891_p6 }
  0x32   :  { %p2894_p9 = pnand %p2893_p8, %p2887_p5 }
  0x34   :  { %2897 = shalt.err (!%p2894_p9)
}
  0x35   :  { %50 = dma.hbm_to_vmem [thread:$0]  %s3503_s2, 8192, %s45_s25, [#allocation7], %s2951_s7, %s2951_s7, %s2952_s8  }
  0x36   :  { %s2898_s17 = scalar_lea.hbm %s3505_s4, 2048 }
  0x37   :  { %p2899_p10 = scmp.ne.s32.totalorder %s3505_s4, %s2898_s17  ;;  %p2902_p11 = scmp.lt.u32.totalorder %s2898_s17, %s3505_s4 }
  0x39   :  { %p2904_p12 = pnand %p2902_p11, %p2899_p10 }
  0x3b   :  { %2907 = shalt.err (!%p2904_p12)
}
  0x3c   :  { %s2908_s23 = scalar_lea.vmem %s3025_s27, 2048  ;;  %p2913_p0 = scmp.lt.s32.totalorder %s3025_s27, %s3025_s27 }
  0x3d   :  { %p2909_p13 = scmp.ne.s32.totalorder %s3025_s27, %s2908_s23  ;;  %p2914_p1 = scmp.lt.s32.totalorder %s2908_s23, %s2908_s23 }
  0x3f   :  { %p2915_p2 = por %p2914_p1, %p2913_p0 }
  0x41   :  { %p2916_p3 = pnand %p2915_p2, %p2909_p13 }
  0x43   :  { %2919 = shalt.err (!%p2916_p3)
}
  0x44   :  { %64 = dma.hbm_to_vmem [thread:$0]  %s3505_s4, 2048, %s3025_s27, [#allocation10], %s2954_s1, %s2954_s1, %s2955_s21  }
  0x45   :  { %2942 = dma.done.wait [#allocation4], 256  }
  0x46   :  { %2943 = vsyncadd [#allocation4], 4294967040 }
  0x47   :  { %2944 = dma.done.wait [#allocation7], 16384  }
  0x48   :  { %2945 = vsyncadd [#allocation7], 4294950912 }
  0x49   :  { %2946 = dma.done.wait [#allocation10], 2048  }
  0x4a   :  { %2947 = vsyncadd [#allocation10], 4294965248  ;;  %v2958_v0 = vmov 0.0   ;;  %v82_v1 = vld [vmem:[#allocation6 + $0x8] sm:$0xff]  ;;  %v84_v3 = vld [vmem:[#allocation6 + $0x18] sm:$0xff] }
  0x4b   :  { %231 = vmatprep.mubr.f32.mxu0 %v2958_v0  ;;  %308 = vmatprep.mubr.f32.mxu1 %v2958_v0  ;;  %v86_v2 = vld [vmem:[#allocation6 + $0x28] sm:$0xff]  ;;  %v88_v5 = vld [vmem:[#allocation6 + $0x38] sm:$0xff]  ;;  %v81_v6 = vld [vmem:[#allocation6] sm:$0xff] }
  0x4c   :  { %v2078_v4 = vpack.c.bf16 %v86_v2, %v82_v1  ;;  %v85_v7 = vld [vmem:[#allocation6 + $0x20] sm:$0xff]  ;;  %v2110_v8 = vpack.c.bf16 %v88_v5, %v84_v3  ;;  %v83_v10 = vld [vmem:[#allocation6 + $0x10] sm:$0xff]  ;;  %v90_v12 = vld [vmem:[#allocation6 + $0x48] sm:$0xff] }
  0x4d   :  { %v2080_v9 = vpack.c.bf16 %v85_v7, %v81_v6  ;;  %v87_v11 = vld [vmem:[#allocation6 + $0x30] sm:$0xff]  ;;  %v94_v14 = vld [vmem:[#allocation6 + $0x68] sm:$0xff]  ;;  %v92_v15 = vld [vmem:[#allocation6 + $0x58] sm:$0xff] }
  0x4e   :  { %2079 = vmatprep.subr.bf16.mxu0 %v2078_v4  ;;  %v2112_v13 = vpack.c.bf16 %v87_v11, %v83_v10  ;;  %v96_v16 = vld [vmem:[#allocation6 + $0x78] sm:$0xff]  ;;  %2111 = vmatprep.subr.bf16.mxu1 %v2110_v8  ;;  %v2082_v17 = vpack.c.bf16 %v94_v14, %v90_v12  ;;  %v89_v19 = vld [vmem:[#allocation6 + $0x40] sm:$0xff]  ;;  %v91_v21 = vld [vmem:[#allocation6 + $0x50] sm:$0xff] }
  0x4f   :  { %2081 = vmatpush1.bf16.msra.mxu0 %v2080_v9  ;;  %v2114_v18 = vpack.c.bf16 %v96_v16, %v92_v15  ;;  %v93_v20 = vld [vmem:[#allocation6 + $0x60] sm:$0xff]  ;;  %v95_v23 = vld [vmem:[#allocation6 + $0x70] sm:$0xff]  ;;  %v98_v24 = vld [vmem:[#allocation6 + $0x88] sm:$0xff] }
  0x50   :  { %2113 = vmatpush1.bf16.msra.mxu1 %v2112_v13  ;;  %v2084_v22 = vpack.c.bf16 %v93_v20, %v89_v19  ;;  %v102_v25 = vld [vmem:[#allocation6 + $0xa8] sm:$0xff]  ;;  %2083 = vmatprep.subr.bf16.mxu0 %v2082_v17  ;;  %v2116_v26 = vpack.c.bf16 %v95_v23, %v91_v21  ;;  %v100_v28 = vld [vmem:[#allocation6 + $0x98] sm:$0xff]  ;;  %v97_v30 = vld [vmem:[#allocation6 + $0x80] sm:$0xff] }
  0x51   :  { %2115 = vmatprep.subr.bf16.mxu1 %v2114_v18  ;;  %v2086_v27 = vpack.c.bf16 %v102_v25, %v98_v24  ;;  %v104_v29 = vld [vmem:[#allocation6 + $0xb8] sm:$0xff]  ;;  %v101_v32 = vld [vmem:[#allocation6 + $0xa0] sm:$0xff]  ;;  %v99_v33 = vld [vmem:[#allocation6 + $0x90] sm:$0xff] }
  0x52   :  { %v2118_v31 = vpack.c.bf16 %v104_v29, %v100_v28  ;;  %v103_v34 = vld [vmem:[#allocation6 + $0xb0] sm:$0xff]  ;;  %v2088_v35 = vpack.c.bf16 %v101_v32, %v97_v30  ;;  %v106_v36 = vld [vmem:[#allocation6 + $0xc8] sm:$0xff]  ;;  %v108_v38 = vld [vmem:[#allocation6 + $0xd8] sm:$0xff] }
  0x53   :  { %2085 = vmatpush1.bf16.msra.mxu0 %v2084_v22  ;;  %v110_v37 = vld [vmem:[#allocation6 + $0xe8] sm:$0xff]  ;;  %v2120_v39 = vpack.c.bf16 %v103_v34, %v99_v33  ;;  %v112_v41 = vld [vmem:[#allocation6 + $0xf8] sm:$0xff]  ;;  %v105_v42 = vld [vmem:[#allocation6 + $0xc0] sm:$0xff] }
  0x54   :  { %2117 = vmatpush1.bf16.msra.mxu1 %v2116_v26  ;;  %2087 = vmatprep.subr.bf16.mxu0 %v2086_v27  ;;  %v2090_v40 = vpack.c.bf16 %v110_v37, %v106_v36  ;;  %v109_v43 = vld [vmem:[#allocation6 + $0xe0] sm:$0xff]  ;;  %v2122_v44 = vpack.c.bf16 %v112_v41, %v108_v38  ;;  %v107_v45 = vld [vmem:[#allocation6 + $0xd0] sm:$0xff]  ;;  %v114_v47 = vld [vmem:[#allocation6 + $0x108] sm:$0xff] }
  0x55   :  { %2119 = vmatprep.subr.bf16.mxu1 %v2118_v31  ;;  %v111_v46 = vld [vmem:[#allocation6 + $0xf0] sm:$0xff]  ;;  %v118_v48 = vld [vmem:[#allocation6 + $0x128] sm:$0xff]  ;;  %v116_v49 = vld [vmem:[#allocation6 + $0x118] sm:$0xff]  ;;  %v2092_v51 = vpack.c.bf16 %v109_v43, %v105_v42 }
  0x56   :  { %v120_v50 = vld [vmem:[#allocation6 + $0x138] sm:$0xff]  ;;  %v2124_v52 = vpack.c.bf16 %v111_v46, %v107_v45  ;;  %v2094_v53 = vpack.c.bf16 %v118_v48, %v114_v47  ;;  %v113_v54 = vld [vmem:[#allocation6 + $0x100] sm:$0xff]  ;;  %v115_v56 = vld [vmem:[#allocation6 + $0x110] sm:$0xff] }
  0x57   :  { %2089 = vmatpush1.bf16.msra.mxu0 %v2088_v35  ;;  %v117_v55 = vld [vmem:[#allocation6 + $0x120] sm:$0xff]  ;;  %v2126_v57 = vpack.c.bf16 %v120_v50, %v116_v49  ;;  %v119_v58 = vld [vmem:[#allocation6 + $0x130] sm:$0xff]  ;;  %v122_v59 = vld [vmem:[#allocation6 + $0x148] sm:$0xff] }
  0x58   :  { %2121 = vmatpush1.bf16.msra.mxu1 %v2120_v39  ;;  %2091 = vmatprep.subr.bf16.mxu0 %v2090_v40  ;;  %v126_v60 = vld [vmem:[#allocation6 + $0x168] sm:$0xff]  ;;  %v124_v61 = vld [vmem:[#allocation6 + $0x158] sm:$0xff]  ;;  %v2096_v63 = vpack.c.bf16 %v117_v55, %v113_v54  ;;  %v2128_v1 = vpack.c.bf16 %v119_v58, %v115_v56  ;;  %v121_v3 = vld [vmem:[#allocation6 + $0x140] sm:$0xff] }
  0x59   :  { %2123 = vmatprep.subr.bf16.mxu1 %v2122_v44  ;;  %v128_v62 = vld [vmem:[#allocation6 + $0x178] sm:$0xff]  ;;  %v2098_v2 = vpack.c.bf16 %v126_v60, %v122_v59  ;;  %v125_v4 = vld [vmem:[#allocation6 + $0x160] sm:$0xff]  ;;  %v123_v5 = vld [vmem:[#allocation6 + $0x150] sm:$0xff] }
  0x5a   :  { %v2130_v6 = vpack.c.bf16 %v128_v62, %v124_v61  ;;  %v127_v7 = vld [vmem:[#allocation6 + $0x170] sm:$0xff]  ;;  %v130_v8 = vld [vmem:[#allocation6 + $0x188] sm:$0xff]  ;;  %v132_v10 = vld [vmem:[#allocation6 + $0x198] sm:$0xff]  ;;  %v2100_v12 = vpack.c.bf16 %v125_v4, %v121_v3 }
  0x5b   :  { %2093 = vmatpush1.bf16.msra.mxu0 %v2092_v51  ;;  %v134_v9 = vld [vmem:[#allocation6 + $0x1a8] sm:$0xff]  ;;  %v136_v11 = vld [vmem:[#allocation6 + $0x1b8] sm:$0xff]  ;;  %v2132_v13 = vpack.c.bf16 %v127_v7, %v123_v5  ;;  %v129_v15 = vld [vmem:[#allocation6 + $0x180] sm:$0xff] }
  0x5c   :  { %2125 = vmatpush1.bf16.msra.mxu1 %v2124_v52  ;;  %2095 = vmatprep.subr.bf16.mxu0 %v2094_v53  ;;  %v2102_v14 = vpack.c.bf16 %v134_v9, %v130_v8  ;;  %v133_v16 = vld [vmem:[#allocation6 + $0x1a0] sm:$0xff]  ;;  %v131_v17 = vld [vmem:[#allocation6 + $0x190] sm:$0xff]  ;;  %v2134_v18 = vpack.c.bf16 %v136_v11, %v132_v10  ;;  %v138_v20 = vld [vmem:[#allocation6 + $0x1c8] sm:$0xff] }
  0x5d   :  { %2127 = vmatprep.subr.bf16.mxu1 %v2126_v57  ;;  %v135_v19 = vld [vmem:[#allocation6 + $0x1b0] sm:$0xff]  ;;  %v142_v21 = vld [vmem:[#allocation6 + $0x1e8] sm:$0xff]  ;;  %v140_v22 = vld [vmem:[#allocation6 + $0x1d8] sm:$0xff]  ;;  %v2104_v24 = vpack.c.bf16 %v133_v16, %v129_v15 }
  0x5e   :  { %v144_v23 = vld [vmem:[#allocation6 + $0x1f8] sm:$0xff]  ;;  %v2136_v25 = vpack.c.bf16 %v135_v19, %v131_v17  ;;  %v2106_v26 = vpack.c.bf16 %v142_v21, %v138_v20  ;;  %v137_v27 = vld [vmem:[#allocation6 + $0x1c0] sm:$0xff]  ;;  %v139_v29 = vld [vmem:[#allocation6 + $0x1d0] sm:$0xff] }
  0x5f   :  { %2097 = vmatpush1.bf16.msra.mxu0 %v2096_v63  ;;  %v141_v28 = vld [vmem:[#allocation6 + $0x1e0] sm:$0xff]  ;;  %v2138_v30 = vpack.c.bf16 %v144_v23, %v140_v22  ;;  %v143_v31 = vld [vmem:[#allocation6 + $0x1f0] sm:$0xff]  ;;  %v322_v32 = vld [vmem:[#allocation8 + $0x8] sm:$0xff] }
  0x60   :  { %2129 = vmatpush1.bf16.msra.mxu1 %v2128_v1  ;;  %2099 = vmatprep.subr.bf16.mxu0 %v2098_v2  ;;  %v326_v33 = vld [vmem:[#allocation8 + $0x28] sm:$0xff]  ;;  %v324_v34 = vld [vmem:[#allocation8 + $0x18] sm:$0xff]  ;;  %v2108_v36 = vpack.c.bf16 %v141_v28, %v137_v27  ;;  %v2140_v37 = vpack.c.bf16 %v143_v31, %v139_v29  ;;  %v321_v39 = vld [vmem:[#allocation8] sm:$0xff] }
  0x61   :  { %2131 = vmatprep.subr.bf16.mxu1 %v2130_v6  ;;  %v328_v35 = vld [vmem:[#allocation8 + $0x38] sm:$0xff]  ;;  %v3064_v38 = vpack.c.bf16 %v326_v33, %v322_v32  ;;  %v325_v40 = vld [vmem:[#allocation8 + $0x20] sm:$0xff]  ;;  %v323_v41 = vld [vmem:[#allocation8 + $0x10] sm:$0xff] }
  0x62   :  { %v3066_v42 = vpack.c.bf16 %v328_v35, %v324_v34  ;;  %v327_v43 = vld [vmem:[#allocation8 + $0x30] sm:$0xff]  ;;  %v330_v44 = vld [vmem:[#allocation8 + $0x48] sm:$0xff]  ;;  %v332_v46 = vld [vmem:[#allocation8 + $0x58] sm:$0xff]  ;;  %v3068_v49 = vpack.c.bf16 %v325_v40, %v321_v39 }
  0x63   :  { %2101 = vmatpush1.bf16.msra.mxu0 %v2100_v12  ;;  %v334_v45 = vld [vmem:[#allocation8 + $0x68] sm:$0xff]  ;;  %v336_v47 = vld [vmem:[#allocation8 + $0x78] sm:$0xff]  ;;  %v79_v48 = vld [vmem:[#allocation3] sm:$0xff]  ;;  %v3071_v50 = vpack.c.bf16 %v327_v43, %v323_v41 }
  0x64   :  { %2133 = vmatpush1.bf16.msra.mxu1 %v2132_v13  ;;  %2103 = vmatprep.subr.bf16.mxu0 %v2102_v14  ;;  %v3073_v51 = vpack.c.bf16 %v334_v45, %v330_v44  ;;  %v329_v52 = vld [vmem:[#allocation8 + $0x40] sm:$0xff]  ;;  %v331_v54 = vld [vmem:[#allocation8 + $0x50] sm:$0xff]  ;;  %v3076_v55 = vpack.c.bf16 %v336_v47, %v332_v46  ;;  %v338_v57 = vld [vmem:[#allocation8 + $0x88] sm:$0xff] }
  0x65   :  { %2135 = vmatprep.subr.bf16.mxu1 %v2134_v18  ;;  %v333_v53 = vld [vmem:[#allocation8 + $0x60] sm:$0xff]  ;;  %v335_v56 = vld [vmem:[#allocation8 + $0x70] sm:$0xff]  ;;  %v342_v58 = vld [vmem:[#allocation8 + $0xa8] sm:$0xff] }
  0x66   :  { %v340_v59 = vld [vmem:[#allocation8 + $0x98] sm:$0xff]  ;;  %v3079_v61 = vpack.c.bf16 %v333_v53, %v329_v52  ;;  %v3083_v62 = vpack.c.bf16 %v335_v56, %v331_v54  ;;  %v3085_v63 = vpack.c.bf16 %v342_v58, %v338_v57  ;;  %v337_v1 = vld [vmem:[#allocation8 + $0x80] sm:$0xff]  ;;  %v339_v3 = vld [vmem:[#allocation8 + $0x90] sm:$0xff] }
  0x67   :  { %2105 = vmatpush1.bf16.msra.mxu0 %v2104_v24  ;;  %v344_v60 = vld [vmem:[#allocation8 + $0xb8] sm:$0xff]  ;;  %v341_v2 = vld [vmem:[#allocation8 + $0xa0] sm:$0xff]  ;;  %v343_v5 = vld [vmem:[#allocation8 + $0xb0] sm:$0xff] }
  0x68   :  { %2137 = vmatpush1.bf16.msra.mxu1 %v2136_v25  ;;  %2107 = vmatprep.subr.bf16.mxu0 %v2106_v26  ;;  %v3088_v4 = vpack.c.bf16 %v344_v60, %v340_v59  ;;  %v346_v6 = vld [vmem:[#allocation8 + $0xc8] sm:$0xff]  ;;  %v348_v8 = vld [vmem:[#allocation8 + $0xd8] sm:$0xff]  ;;  %v3093_v10 = vpack.c.bf16 %v341_v2, %v337_v1  ;;  %v3097_v12 = vpack.c.bf16 %v343_v5, %v339_v3  ;;  %v345_v14 = vld [vmem:[#allocation8 + $0xc0] sm:$0xff] }
  0x69   :  { %2139 = vmatprep.subr.bf16.mxu1 %v2138_v30  ;;  %v350_v7 = vld [vmem:[#allocation8 + $0xe8] sm:$0xff]  ;;  %v352_v9 = vld [vmem:[#allocation8 + $0xf8] sm:$0xff]  ;;  %v349_v15 = vld [vmem:[#allocation8 + $0xe0] sm:$0xff] }
  0x6a   :  { %v80_v11 = vld [vmem:[#allocation3 + $0x8] sm:$0xff]  ;;  %v3099_v13 = vpack.c.bf16 %v350_v7, %v346_v6  ;;  %v347_v16 = vld [vmem:[#allocation8 + $0xd0] sm:$0xff]  ;;  %v3102_v17 = vpack.c.bf16 %v352_v9, %v348_v8  ;;  %v354_v19 = vld [vmem:[#allocation8 + $0x108] sm:$0xff]  ;;  %v3106_v23 = vpack.c.bf16 %v349_v15, %v345_v14 }
  0x6b   :  { %2109 = vmatpush1.bf16.msra.mxu0 %v2108_v36  ;;  %v351_v18 = vld [vmem:[#allocation8 + $0xf0] sm:$0xff]  ;;  %v358_v20 = vld [vmem:[#allocation8 + $0x128] sm:$0xff]  ;;  %v356_v21 = vld [vmem:[#allocation8 + $0x118] sm:$0xff] }
  0x6c   :  { %2141 = vmatpush1.bf16.msra.mxu1 %v2140_v37  ;;  %2143 = vmatprep.subr.bf16.mxu0 %v3064_v38  ;;  %v360_v22 = vld [vmem:[#allocation8 + $0x138] sm:$0xff]  ;;  %v3111_v24 = vpack.c.bf16 %v351_v18, %v347_v16  ;;  %v3113_v25 = vpack.c.bf16 %v358_v20, %v354_v19  ;;  %v353_v26 = vld [vmem:[#allocation8 + $0x100] sm:$0xff]  ;;  %v355_v28 = vld [vmem:[#allocation8 + $0x110] sm:$0xff]  ;;  %v147_v20 = vlaneseq }
  0x6d   :  { %2175 = vmatprep.subr.bf16.mxu1 %v3066_v42  ;;  %v357_v27 = vld [vmem:[#allocation8 + $0x120] sm:$0xff]  ;;  %v3116_v29 = vpack.c.bf16 %v360_v22, %v356_v21  ;;  %v359_v30 = vld [vmem:[#allocation8 + $0x130] sm:$0xff]  ;;  %v362_v31 = vld [vmem:[#allocation8 + $0x148] sm:$0xff] }
  0x6e   :  { %232 = vmatmul.mubr.f32.vlgmr.msra.gmra.mrb[0].mxu0 %v79_v48  ;;  %v366_v32 = vld [vmem:[#allocation8 + $0x168] sm:$0xff]  ;;  %v364_v33 = vld [vmem:[#allocation8 + $0x158] sm:$0xff]  ;;  %v3119_v35 = vpack.c.bf16 %v357_v27, %v353_v26  ;;  %v3123_v36 = vpack.c.bf16 %v359_v30, %v355_v28  ;;  %v361_v39 = vld [vmem:[#allocation8 + $0x140] sm:$0xff]  ;;  %v148_v21 = vshrl.u32 %v147_v20, 7 }
  0x6f   :  { %309 = vmatmul.mubr.f32.vlgmr.msra.gmra.mrb[0].mxu1 %v79_v48  ;;  %2145 = vmatpush1.bf16.msra.mxu0 %v3068_v49  ;;  %v368_v34 = vld [vmem:[#allocation8 + $0x178] sm:$0xff]  ;;  %v3125_v37 = vpack.c.bf16 %v366_v32, %v362_v31  ;;  %v365_v40 = vld [vmem:[#allocation8 + $0x160] sm:$0xff]  ;;  %v363_v41 = vld [vmem:[#allocation8 + $0x150] sm:$0xff] }
  0x70   :  { %2177 = vmatpush1.bf16.msra.mxu1 %v3071_v50  ;;  %2147 = vmatprep.subr.bf16.mxu0 %v3073_v51  ;;  %v3128_v43 = vpack.c.bf16 %v368_v34, %v364_v33  ;;  %v367_v44 = vld [vmem:[#allocation8 + $0x170] sm:$0xff]  ;;  %v370_v45 = vld [vmem:[#allocation8 + $0x188] sm:$0xff]  ;;  %v372_v47 = vld [vmem:[#allocation8 + $0x198] sm:$0xff]  ;;  %v3131_v52 = vpack.c.bf16 %v365_v40, %v361_v39  ;;  %v149_v28 = vsub.s32 0, %v148_v21  ;;  %v153_v32 = vsub.s32 1, %v148_v21 }
  0x71   :  { %2179 = vmatprep.subr.bf16.mxu1 %v3076_v55  ;;  %237 = vmatprep.mubr.f32.mxu0 %v2958_v0  ;;  %v374_v46 = vld [vmem:[#allocation8 + $0x1a8] sm:$0xff]  ;;  %v376_v48 = vld [vmem:[#allocation8 + $0x1b8] sm:$0xff]  ;;  %v3135_v53 = vpack.c.bf16 %v367_v44, %v363_v41  ;;  %v369_v56 = vld [vmem:[#allocation8 + $0x180] sm:$0xff]  ;;  %v157_v33 = vsub.s32 2, %v148_v21  ;;  %v161_v34 = vsub.s32 3, %v148_v21 }
  0x72   :  { %314 = vmatprep.mubr.f32.mxu1 %v2958_v0  ;;  %238 = vmatmul.mubr.f32.gmra.mrb[2].mxu0 %v80_v11  ;;  %v3137_v54 = vpack.c.bf16 %v374_v46, %v370_v45  ;;  %v373_v57 = vld [vmem:[#allocation8 + $0x1a0] sm:$0xff]  ;;  %v371_v58 = vld [vmem:[#allocation8 + $0x190] sm:$0xff]  ;;  %v3140_v59 = vpack.c.bf16 %v376_v48, %v372_v47  ;;  %v378_v1 = vld [vmem:[#allocation8 + $0x1c8] sm:$0xff] }
  0x73   :  { %2149 = vmatpush1.bf16.msra.mxu0 %v3079_v61  ;;  %315 = vmatmul.mubr.f32.gmra.mrb[2].mxu1 %v80_v11  ;;  %v375_v60 = vld [vmem:[#allocation8 + $0x1b0] sm:$0xff]  ;;  %v382_v2 = vld [vmem:[#allocation8 + $0x1e8] sm:$0xff]  ;;  %v380_v3 = vld [vmem:[#allocation8 + $0x1d8] sm:$0xff]  ;;  %v3143_v6 = vpack.c.bf16 %v373_v57, %v369_v56 }
  0x74   :  { %2181 = vmatpush1.bf16.msra.mxu1 %v3083_v62  ;;  %2151 = vmatprep.subr.bf16.mxu0 %v3085_v63  ;;  %v384_v5 = vld [vmem:[#allocation8 + $0x1f8] sm:$0xff]  ;;  %v3147_v7 = vpack.c.bf16 %v375_v60, %v371_v58  ;;  %v3149_v8 = vpack.c.bf16 %v382_v2, %v378_v1  ;;  %v377_v9 = vld [vmem:[#allocation8 + $0x1c0] sm:$0xff]  ;;  %v379_v15 = vld [vmem:[#allocation8 + $0x1d0] sm:$0xff] }
  0x75   :  { %2183 = vmatprep.subr.bf16.mxu1 %v3088_v4  ;;  %449 = vmatprep.mubr.f32.mxu0 %v2958_v0  ;;  %v381_v11 = vld [vmem:[#allocation8 + $0x1e0] sm:$0xff]  ;;  %v3152_v14 = vpack.c.bf16 %v384_v5, %v380_v3  ;;  %v383_v16 = vld [vmem:[#allocation8 + $0x1f0] sm:$0xff] }
  0x76   :  { %520 = vmatprep.mubr.f32.mxu1 %v2958_v0  ;;  %v3155_v18 = vpack.c.bf16 %v381_v11, %v377_v9  ;;  %v3159_v19 = vpack.c.bf16 %v383_v16, %v379_v15  ;;  %v145_v31 = vld [vmem:[%s3504_s3] sm:$0xf] }
  0x77   :  { %2153 = vmatpush1.bf16.msra.mxu0 %v3093_v10  ;;  %v150_v39 = vrot.slane %v145_v31, %v149_v28  ;;  %v154_v40 = vrot.slane %v145_v31, %v153_v32  ;;  %v158_v41 = vrot.slane %v145_v31, %v157_v33  ;;  %v162_v45 = vrot.slane %v145_v31, %v161_v34 }
  0x78   :  { %2185 = vmatpush1.bf16.msra.mxu1 %v3097_v12  ;;  %2155 = vmatprep.subr.bf16.mxu0 %v3099_v13 }
  0x79   :  { %2187 = vmatprep.subr.bf16.mxu1 %v3102_v17 }
  0x7b   :  { %2157 = vmatpush1.bf16.msra.mxu0 %v3106_v23 }
  0x7c   :  { %2189 = vmatpush1.bf16.msra.mxu1 %v3111_v24  ;;  %2159 = vmatprep.subr.bf16.mxu0 %v3113_v25 }
  0x7d   :  { %2191 = vmatprep.subr.bf16.mxu1 %v3116_v29 }
  0x7f   :  { %2161 = vmatpush1.bf16.msra.mxu0 %v3119_v35 }
  0x80   :  { %2193 = vmatpush1.bf16.msra.mxu1 %v3123_v36  ;;  %2163 = vmatprep.subr.bf16.mxu0 %v3125_v37 }
  0x81   :  { %2195 = vmatprep.subr.bf16.mxu1 %v3128_v43 }
  0x83   :  { %2165 = vmatpush1.bf16.msra.mxu0 %v3131_v52 }
  0x84   :  { %2197 = vmatpush1.bf16.msra.mxu1 %v3135_v53  ;;  %2167 = vmatprep.subr.bf16.mxu0 %v3137_v54 }
  0x85   :  { %2199 = vmatprep.subr.bf16.mxu1 %v3140_v59 }
  0x87   :  { %2169 = vmatpush1.bf16.msra.mxu0 %v3143_v6 }
  0x88   :  { %2201 = vmatpush1.bf16.msra.mxu1 %v3147_v7  ;;  %2171 = vmatprep.subr.bf16.mxu0 %v3149_v8 }
  0x89   :  { %2203 = vmatprep.subr.bf16.mxu1 %v3152_v14 }
  0x8b   :  { %2173 = vmatpush1.bf16.msra.mxu0 %v3155_v18 }
  0x8c   :  { %2205 = vmatpush1.bf16.msra.mxu1 %v3159_v19  ;;  %2207 = vmatprep.subr.bf16.mxu0 %v3064_v38 }
  0x8d   :  { %2239 = vmatprep.subr.bf16.mxu1 %v3066_v42 }
  0x8e   :  { %450 = vmatmul.mubr.f32.vlgmr.msra.gmra.mrb[4].mxu0 %v2958_v0 }
  0x8f   :  { %521 = vmatmul.mubr.f32.vlgmr.msra.gmra.mrb[4].mxu1 %v2958_v0  ;;  %2209 = vmatpush1.bf16.msra.mxu0 %v3068_v49 }
  0x90   :  { %2241 = vmatpush1.bf16.msra.mxu1 %v3071_v50  ;;  %2211 = vmatprep.subr.bf16.mxu0 %v3073_v51 }
  0x91   :  { %2243 = vmatprep.subr.bf16.mxu1 %v3076_v55  ;;  %620 = vmatprep.mubr.f32.mxu0 %v2958_v0 }
  0x92   :  { %691 = vmatprep.mubr.f32.mxu1 %v2958_v0 }
  0x93   :  { %2213 = vmatpush1.bf16.msra.mxu0 %v3079_v61 }
  0x94   :  { %2245 = vmatpush1.bf16.msra.mxu1 %v3083_v62  ;;  %2215 = vmatprep.subr.bf16.mxu0 %v3085_v63 }
  0x95   :  { %2247 = vmatprep.subr.bf16.mxu1 %v3088_v4 }
  0x97   :  { %2217 = vmatpush1.bf16.msra.mxu0 %v3093_v10 }
  0x98   :  { %2249 = vmatpush1.bf16.msra.mxu1 %v3097_v12  ;;  %2219 = vmatprep.subr.bf16.mxu0 %v3099_v13 }
  0x99   :  { %2251 = vmatprep.subr.bf16.mxu1 %v3102_v17 }
  0x9b   :  { %2221 = vmatpush1.bf16.msra.mxu0 %v3106_v23 }
  0x9c   :  { %2253 = vmatpush1.bf16.msra.mxu1 %v3111_v24  ;;  %2223 = vmatprep.subr.bf16.mxu0 %v3113_v25 }
  0x9d   :  { %2255 = vmatprep.subr.bf16.mxu1 %v3116_v29 }
  0x9f   :  { %2225 = vmatpush1.bf16.msra.mxu0 %v3119_v35 }
  0xa0   :  { %2257 = vmatpush1.bf16.msra.mxu1 %v3123_v36  ;;  %2227 = vmatprep.subr.bf16.mxu0 %v3125_v37 }
  0xa1   :  { %2259 = vmatprep.subr.bf16.mxu1 %v3128_v43 }
  0xa3   :  { %2229 = vmatpush1.bf16.msra.mxu0 %v3131_v52 }
  0xa4   :  { %2261 = vmatpush1.bf16.msra.mxu1 %v3135_v53  ;;  %2231 = vmatprep.subr.bf16.mxu0 %v3137_v54 }
  0xa5   :  { %2263 = vmatprep.subr.bf16.mxu1 %v3140_v59 }
  0xa7   :  { %2233 = vmatpush1.bf16.msra.mxu0 %v3143_v6 }
  0xa8   :  { %2265 = vmatpush1.bf16.msra.mxu1 %v3147_v7  ;;  %2235 = vmatprep.subr.bf16.mxu0 %v3149_v8 }
  0xa9   :  { %2267 = vmatprep.subr.bf16.mxu1 %v3152_v14 }
  0xab   :  { %2237 = vmatpush1.bf16.msra.mxu0 %v3155_v18 }
  0xac   :  { %2269 = vmatpush1.bf16.msra.mxu1 %v3159_v19  ;;  %2271 = vmatprep.subr.bf16.mxu0 %v3064_v38 }
  0xad   :  { %2303 = vmatprep.subr.bf16.mxu1 %v3066_v42 }
 0x141   :  { %v233_v22 = vpop.f32.mrb[0].mxu0 }
 0x142   :  { %v235_v26 = vpop.f32.mrb[1].mxu0  ;;  %v310_v27 = vpop.f32.mrb[0].mxu1  ;;  %v3213_v1 = vadd.f32 %v233_v22, %v150_v39 }
 0x143   :  { %v312_v30 = vpop.f32.mrb[1].mxu1  ;;  %v3215_v2 = vadd.f32 %v235_v26, %v154_v40  ;;  %v3222_v22 = vadd.f32 %v310_v27, %v158_v41 }
 0x144   :  { %v3219_v28 = vadd.f32 %v312_v30, %v162_v45 }
 0x145   :  { %v239_v44 = vpop.f32.mrb[2].mxu0 }
 0x146   :  { %v3205_v46 = vadd.f32 %v239_v44, %v150_v39  ;;  %v241_v47 = vpop.f32.mrb[3].mxu0  ;;  %v316_v48 = vpop.f32.mrb[2].mxu1 }
 0x147   :  { %v3207_v56 = vadd.f32 %v241_v47, %v154_v40  ;;  %v3209_v57 = vadd.f32 %v316_v48, %v158_v41  ;;  %v318_v58 = vpop.f32.mrb[3].mxu1 }
 0x148   :  { %v3211_v60 = vadd.f32 %v318_v58, %v162_v45 }
 0x161   :  { %v451_v3 = vpop.f32.mrb[4].mxu0 }
 0x162   :  { %v527_v5 = vadd.f32 %v451_v3, %v3213_v1  ;;  %v522_v9 = vpop.f32.mrb[4].mxu1  ;;  %v453_v11 = vpop.f32.mrb[5].mxu0 }
 0x163   :  { %v528_v15 = vadd.f32 %v453_v11, %v3215_v2  ;;  %v524_v16 = vpop.f32.mrb[5].mxu1  ;;  %v529_v32 = vadd.f32 %v522_v9, %v3222_v22 }
 0x164   :  { %v2000_v20 = vmul.f32 -1.442695, %v527_v5  ;;  %v530_v31 = vadd.f32 %v524_v16, %v3219_v28 }
 0x165   :  { %v2001_v21 = vmul.f32 -1.442695, %v528_v15 }
 0x166   :  { %2696 = vpow2.f32 %v2000_v20  ;;  %v2002_v26 = vmul.f32 -1.442695, %v530_v31 }
 0x167   :  { %2698 = vpow2.f32 %v2001_v21 }
 0x168   :  { %2700 = vpow2.f32 %v2002_v26 }
 0x169   :  { %2702 = vtanh.f32 %v529_v32 }
 0x170   :  { %v2697_v33 = vpop.eup %2696 }
 0x171   :  { %v2699_v34 = vpop.eup %2698  ;;  %v534_v39 = vadd.f32 1.0, %v2697_v33 }
 0x172   :  { %v540_v40 = vadd.f32 1.0, %v2699_v34  ;;  %v2701_v44 = vpop.eup %2700 }
 0x173   :  { %2704 = vrcp.f32 %v534_v39  ;;  %v2703_v47 = vpop.eup %2702  ;;  %v547_v58 = vadd.f32 1.0, %v2701_v44 }
 0x174   :  { %2706 = vrcp.f32 %v540_v40 }
 0x175   :  { %2708 = vrcp.f32 %v547_v58 }
 0x17d   :  { %v2705_v30 = vpop.eup %2704 }
 0x17e   :  { %v2707_v45 = vpop.eup %2706  ;;  %v551_v48 = vmul.f32 %v2705_v30, %v2703_v47 }
 0x17f   :  { %v550_v3 = vmul.f32 0.0, %v2707_v45  ;;  %v2709_v41 = vpop.eup %2708 }
 0x181   :  { %v3225_v27 = vadd.f32 %v551_v48, %v550_v3 }
 0x183   :  { %2710 = vtanh.f32 %v3225_v27 }
 0x18d   :  { %v2711_v5 = vpop.eup %2710 }
 0x18e   :  { %v554_v9 = vmul.f32 %v2711_v5, %v2709_v41 }
 0x190   :  { %555 = vst [vmem:[#allocation2] sm:$0x3] %v554_v9  ;;  %621 = vmatmul.mubr.f32.vlgmr.msra.gmra.mrb[6].mxu0 %v554_v9  ;;  %692 = vmatmul.mubr.f32.vlgmr.msra.gmra.mrb[6].mxu1 %v554_v9 }
 0x191   :  { %2273 = vmatpush1.bf16.msra.mxu0 %v3068_v49  ;;  %2305 = vmatpush1.bf16.msra.mxu1 %v3071_v50 }
 0x192   :  { %2275 = vmatprep.subr.bf16.mxu0 %v3073_v51  ;;  %2307 = vmatprep.subr.bf16.mxu1 %v3076_v55 }
 0x193   :  { %809 = vmatprep.mubr.f32.mxu0 %v2958_v0  ;;  %880 = vmatprep.mubr.f32.mxu1 %v2958_v0 }
 0x195   :  { %2277 = vmatpush1.bf16.msra.mxu0 %v3079_v61  ;;  %2309 = vmatpush1.bf16.msra.mxu1 %v3083_v62 }
 0x196   :  { %2279 = vmatprep.subr.bf16.mxu0 %v3085_v63  ;;  %2311 = vmatprep.subr.bf16.mxu1 %v3088_v4 }
 0x199   :  { %2281 = vmatpush1.bf16.msra.mxu0 %v3093_v10  ;;  %2313 = vmatpush1.bf16.msra.mxu1 %v3097_v12 }
 0x19a   :  { %2283 = vmatprep.subr.bf16.mxu0 %v3099_v13  ;;  %2315 = vmatprep.subr.bf16.mxu1 %v3102_v17 }
 0x19d   :  { %2285 = vmatpush1.bf16.msra.mxu0 %v3106_v23  ;;  %2317 = vmatpush1.bf16.msra.mxu1 %v3111_v24 }
 0x19e   :  { %2287 = vmatprep.subr.bf16.mxu0 %v3113_v25  ;;  %2319 = vmatprep.subr.bf16.mxu1 %v3116_v29 }
 0x1a1   :  { %2289 = vmatpush1.bf16.msra.mxu0 %v3119_v35  ;;  %2321 = vmatpush1.bf16.msra.mxu1 %v3123_v36 }
 0x1a2   :  { %2291 = vmatprep.subr.bf16.mxu0 %v3125_v37  ;;  %2323 = vmatprep.subr.bf16.mxu1 %v3128_v43 }
 0x1a5   :  { %2293 = vmatpush1.bf16.msra.mxu0 %v3131_v52  ;;  %2325 = vmatpush1.bf16.msra.mxu1 %v3135_v53 }
 0x1a6   :  { %2295 = vmatprep.subr.bf16.mxu0 %v3137_v54  ;;  %2327 = vmatprep.subr.bf16.mxu1 %v3140_v59 }
 0x1a9   :  { %2297 = vmatpush1.bf16.msra.mxu0 %v3143_v6  ;;  %2329 = vmatpush1.bf16.msra.mxu1 %v3147_v7 }
 0x1aa   :  { %2299 = vmatprep.subr.bf16.mxu0 %v3149_v8  ;;  %2331 = vmatprep.subr.bf16.mxu1 %v3152_v14 }
 0x1ad   :  { %2301 = vmatpush1.bf16.msra.mxu0 %v3155_v18  ;;  %2333 = vmatpush1.bf16.msra.mxu1 %v3159_v19 }
 0x1ae   :  { %2335 = vmatprep.subr.bf16.mxu0 %v3064_v38  ;;  %2367 = vmatprep.subr.bf16.mxu1 %v3066_v42 }
 0x263   :  { %v622_v11 = vpop.f32.mrb[6].mxu0  ;;  %v693_v15 = vpop.f32.mrb[6].mxu1 }
 0x264   :  { %v702_v16 = vrot.slane %v622_v11, 6  ;;  %v624_v20 = vpop.f32.mrb[7].mxu0  ;;  %v695_v21 = vpop.f32.mrb[7].mxu1  ;;  %v704_v44 = vrot.slane %v693_v15, 6  ;;  %v734_v11 = vrot.slane %v3225_v27, 6 }
 0x265   :  { %v703_v31 = vrot.slane %v624_v20, 6  ;;  %v705_v39 = vrot.slane %v695_v21, 6 }
 0x266   :  { %v710_v26 = vadd.f32 %v702_v16, %v3213_v1  ;;  %v712_v30 = vadd.f32 %v704_v44, %v3222_v22 }
 0x267   :  { %v711_v32 = vadd.f32 %v703_v31, %v3215_v2  ;;  %v713_v40 = vadd.f32 %v705_v39, %v3219_v28 }
 0x268   :  { %v2003_v33 = vmul.f32 -1.442695, %v710_v26 }
 0x269   :  { %v2004_v34 = vmul.f32 -1.442695, %v711_v32  ;;  %v2005_v47 = vmul.f32 -1.442695, %v713_v40 }
 0x26a   :  { %2712 = vpow2.f32 %v2003_v33 }
 0x26b   :  { %2714 = vpow2.f32 %v2004_v34 }
 0x26c   :  { %2716 = vpow2.f32 %v2005_v47 }
 0x26d   :  { %2718 = vtanh.f32 %v712_v30 }
 0x274   :  { %v2713_v45 = vpop.eup %2712 }
 0x275   :  { %v2715_v48 = vpop.eup %2714  ;;  %v717_v58 = vadd.f32 1.0, %v2713_v45 }
 0x276   :  { %v723_v3 = vadd.f32 1.0, %v2715_v48  ;;  %v2717_v41 = vpop.eup %2716 }
 0x277   :  { %2720 = vrcp.f32 %v717_v58  ;;  %v2719_v5 = vpop.eup %2718  ;;  %v730_v21 = vadd.f32 1.0, %v2717_v41 }
 0x278   :  { %2722 = vrcp.f32 %v723_v3 }
 0x279   :  { %2724 = vrcp.f32 %v730_v21 }
 0x281   :  { %v2721_v9 = vpop.eup %2720 }
 0x282   :  { %v2723_v16 = vpop.eup %2722  ;;  %v737_v20 = vmul.f32 %v2721_v9, %v2719_v5 }
 0x283   :  { %v736_v15 = vmul.f32 %v2723_v16, %v734_v11  ;;  %v2725_v26 = vpop.eup %2724 }
 0x285   :  { %v3267_v31 = vadd.f32 %v737_v20, %v736_v15 }
 0x287   :  { %2726 = vtanh.f32 %v3267_v31 }
 0x291   :  { %v2727_v32 = vpop.eup %2726 }
 0x292   :  { %v740_v33 = vmul.f32 %v2727_v32, %v2725_v26 }
 0x294   :  { %741 = vst [vmem:[#allocation2] sm:$0xc] %v740_v33  ;;  %v743_v34 = vrot.slane %v740_v33, 2 }
 0x296   :  { %810 = vmatmul.mubr.f32.vlgmr.msra.gmra.mrb[8].mxu0 %v743_v34  ;;  %881 = vmatmul.mubr.f32.vlgmr.msra.gmra.mrb[8].mxu1 %v743_v34 }
 0x297   :  { %2337 = vmatpush1.bf16.msra.mxu0 %v3068_v49  ;;  %2369 = vmatpush1.bf16.msra.mxu1 %v3071_v50 }
 0x298   :  { %2339 = vmatprep.subr.bf16.mxu0 %v3073_v51  ;;  %2371 = vmatprep.subr.bf16.mxu1 %v3076_v55 }
 0x299   :  { %998 = vmatprep.mubr.f32.mxu0 %v2958_v0  ;;  %1069 = vmatprep.mubr.f32.mxu1 %v2958_v0 }
 0x29b   :  { %2341 = vmatpush1.bf16.msra.mxu0 %v3079_v61  ;;  %2373 = vmatpush1.bf16.msra.mxu1 %v3083_v62 }
 0x29c   :  { %2343 = vmatprep.subr.bf16.mxu0 %v3085_v63  ;;  %2375 = vmatprep.subr.bf16.mxu1 %v3088_v4 }
 0x29f   :  { %2345 = vmatpush1.bf16.msra.mxu0 %v3093_v10  ;;  %2377 = vmatpush1.bf16.msra.mxu1 %v3097_v12 }
 0x2a0   :  { %2347 = vmatprep.subr.bf16.mxu0 %v3099_v13  ;;  %2379 = vmatprep.subr.bf16.mxu1 %v3102_v17 }
 0x2a3   :  { %2349 = vmatpush1.bf16.msra.mxu0 %v3106_v23  ;;  %2381 = vmatpush1.bf16.msra.mxu1 %v3111_v24 }
 0x2a4   :  { %2351 = vmatprep.subr.bf16.mxu0 %v3113_v25  ;;  %2383 = vmatprep.subr.bf16.mxu1 %v3116_v29 }
 0x2a7   :  { %2353 = vmatpush1.bf16.msra.mxu0 %v3119_v35  ;;  %2385 = vmatpush1.bf16.msra.mxu1 %v3123_v36 }
 0x2a8   :  { %2355 = vmatprep.subr.bf16.mxu0 %v3125_v37  ;;  %2387 = vmatprep.subr.bf16.mxu1 %v3128_v43 }
 0x2ab   :  { %2357 = vmatpush1.bf16.msra.mxu0 %v3131_v52  ;;  %2389 = vmatpush1.bf16.msra.mxu1 %v3135_v53 }
 0x2ac   :  { %2359 = vmatprep.subr.bf16.mxu0 %v3137_v54  ;;  %2391 = vmatprep.subr.bf16.mxu1 %v3140_v59 }
 0x2af   :  { %2361 = vmatpush1.bf16.msra.mxu0 %v3143_v6  ;;  %2393 = vmatpush1.bf16.msra.mxu1 %v3147_v7 }
 0x2b0   :  { %2363 = vmatprep.subr.bf16.mxu0 %v3149_v8  ;;  %2395 = vmatprep.subr.bf16.mxu1 %v3152_v14 }
 0x2b3   :  { %2365 = vmatpush1.bf16.msra.mxu0 %v3155_v18  ;;  %2397 = vmatpush1.bf16.msra.mxu1 %v3159_v19 }
 0x2b4   :  { %2399 = vmatprep.subr.bf16.mxu0 %v3064_v38  ;;  %2431 = vmatprep.subr.bf16.mxu1 %v3066_v42 }
 0x369   :  { %v811_v27 = vpop.f32.mrb[8].mxu0  ;;  %v882_v39 = vpop.f32.mrb[8].mxu1 }
 0x36a   :  { %v891_v40 = vrot.slane %v811_v27, 4  ;;  %v813_v44 = vpop.f32.mrb[9].mxu0  ;;  %v884_v47 = vpop.f32.mrb[9].mxu1  ;;  %v893_v9 = vrot.slane %v882_v39, 4  ;;  %v923_v27 = vrot.slane %v3267_v31, 6 }
 0x36b   :  { %v892_v30 = vrot.slane %v813_v44, 4  ;;  %v894_v41 = vrot.slane %v884_v47, 4 }
 0x36c   :  { %v899_v45 = vadd.f32 %v891_v40, %v3213_v1  ;;  %v901_v16 = vadd.f32 %v893_v9, %v3222_v22 }
 0x36d   :  { %v900_v48 = vadd.f32 %v892_v30, %v3215_v2  ;;  %v902_v5 = vadd.f32 %v894_v41, %v3219_v28 }
 0x36e   :  { %v2006_v58 = vmul.f32 -1.442695, %v899_v45 }
 0x36f   :  { %v2007_v3 = vmul.f32 -1.442695, %v900_v48  ;;  %v2008_v11 = vmul.f32 -1.442695, %v902_v5 }
 0x370   :  { %2728 = vpow2.f32 %v2006_v58 }
 0x371   :  { %2730 = vpow2.f32 %v2007_v3 }
 0x372   :  { %2732 = vpow2.f32 %v2008_v11 }
 0x373   :  { %2734 = vtanh.f32 %v901_v16 }
 0x37a   :  { %v2729_v20 = vpop.eup %2728 }
 0x37b   :  { %v2731_v21 = vpop.eup %2730  ;;  %v906_v15 = vadd.f32 1.0, %v2729_v20 }
 0x37c   :  { %v912_v26 = vadd.f32 1.0, %v2731_v21  ;;  %v2733_v32 = vpop.eup %2732 }
 0x37d   :  { %2736 = vrcp.f32 %v906_v15  ;;  %v2735_v33 = vpop.eup %2734  ;;  %v919_v47 = vadd.f32 1.0, %v2733_v32 }
 0x37e   :  { %2738 = vrcp.f32 %v912_v26 }
 0x37f   :  { %2740 = vrcp.f32 %v919_v47 }
 0x387   :  { %v2737_v34 = vpop.eup %2736 }
 0x388   :  { %v2739_v40 = vpop.eup %2738  ;;  %v926_v44 = vmul.f32 %v2737_v34, %v2735_v33 }
 0x389   :  { %v925_v39 = vmul.f32 %v2739_v40, %v923_v27  ;;  %v2741_v45 = vpop.eup %2740 }
 0x38b   :  { %v3309_v30 = vadd.f32 %v926_v44, %v925_v39 }
 0x38d   :  { %2742 = vtanh.f32 %v3309_v30 }
 0x397   :  { %v2743_v48 = vpop.eup %2742 }
 0x398   :  { %v929_v58 = vmul.f32 %v2743_v48, %v2741_v45 }
 0x39a   :  { %930 = vst [vmem:[#allocation2] sm:$0x30] %v929_v58  ;;  %v932_v3 = vrot.slane %v929_v58, 4  ;;  %v1112_v58 = vrot.slane %v3309_v30, 6 }
 0x39c   :  { %999 = vmatmul.mubr.f32.vlgmr.msra.gmra.mrb[10].mxu0 %v932_v3  ;;  %1070 = vmatmul.mubr.f32.vlgmr.msra.gmra.mrb[10].mxu1 %v932_v3 }
 0x39d   :  { %2401 = vmatpush1.bf16.msra.mxu0 %v3068_v49  ;;  %2433 = vmatpush1.bf16.msra.mxu1 %v3071_v50 }
 0x39e   :  { %2403 = vmatprep.subr.bf16.mxu0 %v3073_v51  ;;  %2435 = vmatprep.subr.bf16.mxu1 %v3076_v55 }
 0x39f   :  { %1187 = vmatprep.mubr.f32.mxu0 %v2958_v0  ;;  %1258 = vmatprep.mubr.f32.mxu1 %v2958_v0 }
 0x3a1   :  { %2405 = vmatpush1.bf16.msra.mxu0 %v3079_v61  ;;  %2437 = vmatpush1.bf16.msra.mxu1 %v3083_v62 }
 0x3a2   :  { %2407 = vmatprep.subr.bf16.mxu0 %v3085_v63  ;;  %2439 = vmatprep.subr.bf16.mxu1 %v3088_v4 }
 0x3a5   :  { %2409 = vmatpush1.bf16.msra.mxu0 %v3093_v10  ;;  %2441 = vmatpush1.bf16.msra.mxu1 %v3097_v12 }
 0x3a6   :  { %2411 = vmatprep.subr.bf16.mxu0 %v3099_v13  ;;  %2443 = vmatprep.subr.bf16.mxu1 %v3102_v17 }
 0x3a9   :  { %2413 = vmatpush1.bf16.msra.mxu0 %v3106_v23  ;;  %2445 = vmatpush1.bf16.msra.mxu1 %v3111_v24 }
 0x3aa   :  { %2415 = vmatprep.subr.bf16.mxu0 %v3113_v25  ;;  %2447 = vmatprep.subr.bf16.mxu1 %v3116_v29 }
 0x3ad   :  { %2417 = vmatpush1.bf16.msra.mxu0 %v3119_v35  ;;  %2449 = vmatpush1.bf16.msra.mxu1 %v3123_v36 }
 0x3ae   :  { %2419 = vmatprep.subr.bf16.mxu0 %v3125_v37  ;;  %2451 = vmatprep.subr.bf16.mxu1 %v3128_v43 }
 0x3b1   :  { %2421 = vmatpush1.bf16.msra.mxu0 %v3131_v52  ;;  %2453 = vmatpush1.bf16.msra.mxu1 %v3135_v53 }
 0x3b2   :  { %2423 = vmatprep.subr.bf16.mxu0 %v3137_v54  ;;  %2455 = vmatprep.subr.bf16.mxu1 %v3140_v59 }
 0x3b5   :  { %2425 = vmatpush1.bf16.msra.mxu0 %v3143_v6  ;;  %2457 = vmatpush1.bf16.msra.mxu1 %v3147_v7 }
 0x3b6   :  { %2427 = vmatprep.subr.bf16.mxu0 %v3149_v8  ;;  %2459 = vmatprep.subr.bf16.mxu1 %v3152_v14 }
 0x3b9   :  { %2429 = vmatpush1.bf16.msra.mxu0 %v3155_v18  ;;  %2461 = vmatpush1.bf16.msra.mxu1 %v3159_v19 }
 0x3ba   :  { %2463 = vmatprep.subr.bf16.mxu0 %v3064_v38  ;;  %2495 = vmatprep.subr.bf16.mxu1 %v3066_v42 }
 0x46f   :  { %v1000_v31 = vpop.f32.mrb[10].mxu0  ;;  %v1071_v41 = vpop.f32.mrb[10].mxu1 }
 0x470   :  { %v1080_v5 = vrot.slane %v1000_v31, 2  ;;  %v1002_v9 = vpop.f32.mrb[11].mxu0  ;;  %v1073_v11 = vpop.f32.mrb[11].mxu1  ;;  %v1082_v34 = vrot.slane %v1071_v41, 2 }
 0x471   :  { %v1081_v16 = vrot.slane %v1002_v9, 2  ;;  %v1083_v32 = vrot.slane %v1073_v11, 2 }
 0x472   :  { %v1088_v20 = vadd.f32 %v1080_v5, %v3213_v1  ;;  %v1090_v40 = vadd.f32 %v1082_v34, %v3222_v22 }
 0x473   :  { %v1089_v21 = vadd.f32 %v1081_v16, %v3215_v2  ;;  %v1091_v33 = vadd.f32 %v1083_v32, %v3219_v28 }
 0x474   :  { %v2009_v15 = vmul.f32 -1.442695, %v1088_v20 }
 0x475   :  { %v2010_v26 = vmul.f32 -1.442695, %v1089_v21  ;;  %v2011_v27 = vmul.f32 -1.442695, %v1091_v33 }
 0x476   :  { %2744 = vpow2.f32 %v2009_v15 }
 0x477   :  { %2746 = vpow2.f32 %v2010_v26 }
 0x478   :  { %2748 = vpow2.f32 %v2011_v27 }
 0x479   :  { %2750 = vtanh.f32 %v1090_v40 }
 0x480   :  { %v2745_v44 = vpop.eup %2744 }
 0x481   :  { %v2747_v47 = vpop.eup %2746  ;;  %v1095_v39 = vadd.f32 1.0, %v2745_v44 }
 0x482   :  { %v1101_v45 = vadd.f32 1.0, %v2747_v47  ;;  %v2749_v1 = vpop.eup %2748 }
 0x483   :  { %2752 = vrcp.f32 %v1095_v39  ;;  %v2751_v2 = vpop.eup %2750  ;;  %v1108_v28 = vadd.f32 1.0, %v2749_v1 }
 0x484   :  { %2754 = vrcp.f32 %v1101_v45 }
 0x485   :  { %2756 = vrcp.f32 %v1108_v28 }
 0x48d   :  { %v2753_v48 = vpop.eup %2752 }
 0x48e   :  { %v2755_v3 = vpop.eup %2754  ;;  %v1115_v31 = vmul.f32 %v2753_v48, %v2751_v2 }
 0x48f   :  { %v1114_v41 = vmul.f32 %v2755_v3, %v1112_v58  ;;  %v2757_v22 = vpop.eup %2756 }
 0x491   :  { %v3351_v5 = vadd.f32 %v1115_v31, %v1114_v41 }
 0x493   :  { %2758 = vtanh.f32 %v3351_v5  ;;  %v1289_v3 = vrot.slane %v3351_v5, 6 }
 0x49d   :  { %v2759_v9 = vpop.eup %2758 }
 0x49e   :  { %v1118_v11 = vmul.f32 %v2759_v9, %v2757_v22 }
 0x4a0   :  { %1119 = vst [vmem:[#allocation2] sm:$0xc0] %v1118_v11  ;;  %v1121_v16 = vrot.slane %v1118_v11, 6 }
 0x4a2   :  { %1188 = vmatmul.mubr.f32.vlgmr.msra.gmra.mrb[12].mxu0 %v1121_v16  ;;  %1259 = vmatmul.mubr.f32.vlgmr.msra.gmra.mrb[12].mxu1 %v1121_v16 }
 0x4a3   :  { %2465 = vmatpush1.bf16.msra.mxu0 %v3068_v49  ;;  %2497 = vmatpush1.bf16.msra.mxu1 %v3071_v50 }
 0x4a4   :  { %2467 = vmatprep.subr.bf16.mxu0 %v3073_v51  ;;  %2499 = vmatprep.subr.bf16.mxu1 %v3076_v55 }
 0x4a5   :  { %1361 = vmatprep.mubr.f32.mxu0 %v2958_v0  ;;  %1432 = vmatprep.mubr.f32.mxu1 %v2958_v0 }
 0x4a7   :  { %2469 = vmatpush1.bf16.msra.mxu0 %v3079_v61  ;;  %2501 = vmatpush1.bf16.msra.mxu1 %v3083_v62 }
 0x4a8   :  { %2471 = vmatprep.subr.bf16.mxu0 %v3085_v63  ;;  %2503 = vmatprep.subr.bf16.mxu1 %v3088_v4 }
 0x4ab   :  { %2473 = vmatpush1.bf16.msra.mxu0 %v3093_v10  ;;  %2505 = vmatpush1.bf16.msra.mxu1 %v3097_v12 }
 0x4ac   :  { %2475 = vmatprep.subr.bf16.mxu0 %v3099_v13  ;;  %2507 = vmatprep.subr.bf16.mxu1 %v3102_v17 }
 0x4af   :  { %2477 = vmatpush1.bf16.msra.mxu0 %v3106_v23  ;;  %2509 = vmatpush1.bf16.msra.mxu1 %v3111_v24 }
 0x4b0   :  { %2479 = vmatprep.subr.bf16.mxu0 %v3113_v25  ;;  %2511 = vmatprep.subr.bf16.mxu1 %v3116_v29 }
 0x4b3   :  { %2481 = vmatpush1.bf16.msra.mxu0 %v3119_v35  ;;  %2513 = vmatpush1.bf16.msra.mxu1 %v3123_v36 }
 0x4b4   :  { %2483 = vmatprep.subr.bf16.mxu0 %v3125_v37  ;;  %2515 = vmatprep.subr.bf16.mxu1 %v3128_v43 }
 0x4b7   :  { %2485 = vmatpush1.bf16.msra.mxu0 %v3131_v52  ;;  %2517 = vmatpush1.bf16.msra.mxu1 %v3135_v53 }
 0x4b8   :  { %2487 = vmatprep.subr.bf16.mxu0 %v3137_v54  ;;  %2519 = vmatprep.subr.bf16.mxu1 %v3140_v59 }
 0x4bb   :  { %2489 = vmatpush1.bf16.msra.mxu0 %v3143_v6  ;;  %2521 = vmatpush1.bf16.msra.mxu1 %v3147_v7 }
 0x4bc   :  { %2491 = vmatprep.subr.bf16.mxu0 %v3149_v8  ;;  %2523 = vmatprep.subr.bf16.mxu1 %v3152_v14 }
 0x4bf   :  { %2493 = vmatpush1.bf16.msra.mxu0 %v3155_v18  ;;  %2525 = vmatpush1.bf16.msra.mxu1 %v3159_v19 }
 0x4c0   :  { %2527 = vmatprep.subr.bf16.mxu0 %v3064_v38  ;;  %2559 = vmatprep.subr.bf16.mxu1 %v3066_v42 }
 0x575   :  { %v1189_v30 = vpop.f32.mrb[12].mxu0  ;;  %v1260_v20 = vpop.f32.mrb[12].mxu1 }
 0x576   :  { %v1265_v21 = vadd.f32 %v1189_v30, %v3205_v46  ;;  %v1191_v15 = vpop.f32.mrb[13].mxu0  ;;  %v1262_v26 = vpop.f32.mrb[13].mxu1  ;;  %v1267_v44 = vadd.f32 %v1260_v20, %v3209_v57 }
 0x577   :  { %v1266_v32 = vadd.f32 %v1191_v15, %v3207_v56  ;;  %v1268_v27 = vadd.f32 %v1262_v26, %v3211_v60 }
 0x578   :  { %v2012_v33 = vmul.f32 -1.442695, %v1265_v21 }
 0x579   :  { %v2013_v34 = vmul.f32 -1.442695, %v1266_v32  ;;  %v2014_v40 = vmul.f32 -1.442695, %v1268_v27 }
 0x57a   :  { %2760 = vpow2.f32 %v2012_v33 }
 0x57b   :  { %2762 = vpow2.f32 %v2013_v34 }
 0x57c   :  { %2764 = vpow2.f32 %v2014_v40 }
 0x57d   :  { %2766 = vtanh.f32 %v1267_v44 }
 0x584   :  { %v2761_v47 = vpop.eup %2760 }
 0x585   :  { %v2763_v39 = vpop.eup %2762  ;;  %v1272_v45 = vadd.f32 1.0, %v2761_v47 }
 0x586   :  { %v1278_v1 = vadd.f32 1.0, %v2763_v39  ;;  %v2765_v2 = vpop.eup %2764 }
 0x587   :  { %2768 = vrcp.f32 %v1272_v45  ;;  %v2767_v48 = vpop.eup %2766  ;;  %v1285_v41 = vadd.f32 1.0, %v2765_v2 }
 0x588   :  { %2770 = vrcp.f32 %v1278_v1 }
 0x589   :  { %2772 = vrcp.f32 %v1285_v41 }
 0x591   :  { %v2769_v58 = vpop.eup %2768 }
 0x592   :  { %v2771_v31 = vpop.eup %2770  ;;  %v1292_v28 = vmul.f32 %v2769_v58, %v2767_v48 }
 0x593   :  { %v1291_v22 = vmul.f32 %v2771_v31, %v1289_v3  ;;  %v2773_v11 = vpop.eup %2772 }
 0x595   :  { %v3393_v9 = vadd.f32 %v1292_v28, %v1291_v22 }
 0x597   :  { %2774 = vtanh.f32 %v3393_v9  ;;  %v1475_v28 = vrot.slane %v3393_v9, 6 }
 0x5a1   :  { %v2775_v16 = vpop.eup %2774 }
 0x5a2   :  { %v1295_v30 = vmul.f32 %v2775_v16, %v2773_v11 }
 0x5a4   :  { %1296 = vst [vmem:[#allocation2 + $0x8] sm:$0x3] %v1295_v30  ;;  %1362 = vmatmul.mubr.f32.vlgmr.msra.gmra.mrb[14].mxu0 %v1295_v30  ;;  %1433 = vmatmul.mubr.f32.vlgmr.msra.gmra.mrb[14].mxu1 %v1295_v30 }
 0x5a5   :  { %2529 = vmatpush1.bf16.msra.mxu0 %v3068_v49  ;;  %2561 = vmatpush1.bf16.msra.mxu1 %v3071_v50 }
 0x5a6   :  { %2531 = vmatprep.subr.bf16.mxu0 %v3073_v51  ;;  %2563 = vmatprep.subr.bf16.mxu1 %v3076_v55 }
 0x5a7   :  { %1550 = vmatprep.mubr.f32.mxu0 %v2958_v0  ;;  %1621 = vmatprep.mubr.f32.mxu1 %v2958_v0 }
 0x5a9   :  { %2533 = vmatpush1.bf16.msra.mxu0 %v3079_v61  ;;  %2565 = vmatpush1.bf16.msra.mxu1 %v3083_v62 }
 0x5aa   :  { %2535 = vmatprep.subr.bf16.mxu0 %v3085_v63  ;;  %2567 = vmatprep.subr.bf16.mxu1 %v3088_v4 }
 0x5ad   :  { %2537 = vmatpush1.bf16.msra.mxu0 %v3093_v10  ;;  %2569 = vmatpush1.bf16.msra.mxu1 %v3097_v12 }
 0x5ae   :  { %2539 = vmatprep.subr.bf16.mxu0 %v3099_v13  ;;  %2571 = vmatprep.subr.bf16.mxu1 %v3102_v17 }
 0x5b1   :  { %2541 = vmatpush1.bf16.msra.mxu0 %v3106_v23  ;;  %2573 = vmatpush1.bf16.msra.mxu1 %v3111_v24 }
 0x5b2   :  { %2543 = vmatprep.subr.bf16.mxu0 %v3113_v25  ;;  %2575 = vmatprep.subr.bf16.mxu1 %v3116_v29 }
 0x5b5   :  { %2545 = vmatpush1.bf16.msra.mxu0 %v3119_v35  ;;  %2577 = vmatpush1.bf16.msra.mxu1 %v3123_v36 }
 0x5b6   :  { %2547 = vmatprep.subr.bf16.mxu0 %v3125_v37  ;;  %2579 = vmatprep.subr.bf16.mxu1 %v3128_v43 }
 0x5b9   :  { %2549 = vmatpush1.bf16.msra.mxu0 %v3131_v52  ;;  %2581 = vmatpush1.bf16.msra.mxu1 %v3135_v53 }
 0x5ba   :  { %2551 = vmatprep.subr.bf16.mxu0 %v3137_v54  ;;  %2583 = vmatprep.subr.bf16.mxu1 %v3140_v59 }
 0x5bd   :  { %2553 = vmatpush1.bf16.msra.mxu0 %v3143_v6  ;;  %2585 = vmatpush1.bf16.msra.mxu1 %v3147_v7 }
 0x5be   :  { %2555 = vmatprep.subr.bf16.mxu0 %v3149_v8  ;;  %2587 = vmatprep.subr.bf16.mxu1 %v3152_v14 }
 0x5c1   :  { %2557 = vmatpush1.bf16.msra.mxu0 %v3155_v18  ;;  %2589 = vmatpush1.bf16.msra.mxu1 %v3159_v19 }
 0x5c2   :  { %2591 = vmatprep.subr.bf16.mxu0 %v3064_v38  ;;  %2623 = vmatprep.subr.bf16.mxu1 %v3066_v42 }
 0x677   :  { %v1363_v5 = vpop.f32.mrb[14].mxu0  ;;  %v1434_v20 = vpop.f32.mrb[14].mxu1 }
 0x678   :  { %v1443_v21 = vrot.slane %v1363_v5, 6  ;;  %v1365_v15 = vpop.f32.mrb[15].mxu0  ;;  %v1436_v26 = vpop.f32.mrb[15].mxu1  ;;  %v1445_v38 = vrot.slane %v1434_v20, 6 }
 0x679   :  { %v1444_v32 = vrot.slane %v1365_v15, 6  ;;  %v1446_v44 = vrot.slane %v1436_v26, 6  ;;  %v1861_v26 = vld [vmem:[#allocation2] sm:$0xff] }
 0x67a   :  { %v1451_v33 = vadd.f32 %v1443_v21, %v3205_v46  ;;  %v1453_v42 = vadd.f32 %v1445_v38, %v3209_v57  ;;  %v1868_v38 = vld [vmem:[#allocation9 + $0x28] sm:$0xff] }
 0x67b   :  { %v1452_v34 = vadd.f32 %v1444_v32, %v3207_v56  ;;  %v1454_v47 = vadd.f32 %v1446_v44, %v3211_v60  ;;  %v1863_v32 = vld [vmem:[#allocation9] sm:$0xff] }
 0x67c   :  { %v2015_v27 = vmul.f32 -1.442695, %v1451_v33  ;;  %v1864_v33 = vld [vmem:[#allocation9 + $0x8] sm:$0xff] }
 0x67d   :  { %v2016_v40 = vmul.f32 -1.442695, %v1452_v34  ;;  %v2017_v39 = vmul.f32 -1.442695, %v1454_v47  ;;  %v2654_v34 = vpack.c.bf16 %v1864_v33, %v1863_v32  ;;  %v1867_v47 = vld [vmem:[#allocation9 + $0x20] sm:$0xff] }
 0x67e   :  { %2776 = vpow2.f32 %v2015_v27  ;;  %v1865_v27 = vld [vmem:[#allocation9 + $0x10] sm:$0xff] }
 0x67f   :  { %2778 = vpow2.f32 %v2016_v40  ;;  %v1866_v40 = vld [vmem:[#allocation9 + $0x18] sm:$0xff] }
 0x680   :  { %2780 = vpow2.f32 %v2017_v39  ;;  %v2658_v44 = vpack.c.bf16 %v1866_v40, %v1865_v27  ;;  %v2662_v39 = vpack.c.bf16 %v1868_v38, %v1867_v47 }
 0x681   :  { %2782 = vtanh.f32 %v1453_v42  ;;  %v1869_v42 = vld [vmem:[#allocation9 + $0x30] sm:$0xff] }
 0x688   :  { %v2777_v45 = vpop.eup %2776 }
 0x689   :  { %v2779_v1 = vpop.eup %2778  ;;  %v1458_v2 = vadd.f32 1.0, %v2777_v45  ;;  %v1870_v45 = vld [vmem:[#allocation9 + $0x38] sm:$0xff] }
 0x68a   :  { %v1464_v48 = vadd.f32 1.0, %v2779_v1  ;;  %v2781_v58 = vpop.eup %2780  ;;  %v2666_v1 = vpack.c.bf16 %v1870_v45, %v1869_v42 }
 0x68b   :  { %2784 = vrcp.f32 %v1458_v2  ;;  %v2783_v3 = vpop.eup %2782  ;;  %v1471_v11 = vadd.f32 1.0, %v2781_v58  ;;  %v1871_v2 = vld [vmem:[#allocation9 + $0x40] sm:$0xff] }
 0x68c   :  { %2786 = vrcp.f32 %v1464_v48  ;;  %v1872_v48 = vld [vmem:[#allocation9 + $0x48] sm:$0xff] }
 0x68d   :  { %2788 = vrcp.f32 %v1471_v11  ;;  %v2670_v58 = vpack.c.bf16 %v1872_v48, %v1871_v2 }
 0x695   :  { %v2785_v31 = vpop.eup %2784 }
 0x696   :  { %v2787_v41 = vpop.eup %2786  ;;  %v1478_v22 = vmul.f32 %v2785_v31, %v2783_v3  ;;  %v1873_v3 = vld [vmem:[#allocation9 + $0x50] sm:$0xff]  ;;  %v1874_v31 = vld [vmem:[#allocation9 + $0x58] sm:$0xff] }
 0x697   :  { %v1477_v16 = vmul.f32 %v2787_v41, %v1475_v28  ;;  %v2789_v5 = vpop.eup %2788  ;;  %v2674_v28 = vpack.c.bf16 %v1874_v31, %v1873_v3  ;;  %v1875_v41 = vld [vmem:[#allocation9 + $0x60] sm:$0xff] }
 0x699   :  { %v3435_v30 = vadd.f32 %v1478_v22, %v1477_v16  ;;  %v1876_v22 = vld [vmem:[#allocation9 + $0x68] sm:$0xff]  ;;  %v1877_v16 = vld [vmem:[#allocation9 + $0x70] sm:$0xff] }
 0x69a   :  { %v2678_v11 = vpack.c.bf16 %v1876_v22, %v1875_v41 }
 0x69b   :  { %2790 = vtanh.f32 %v3435_v30 }
 0x6a5   :  { %v2791_v20 = vpop.eup %2790 }
 0x6a6   :  { %v1481_v21 = vmul.f32 %v2791_v20, %v2789_v5 }
 0x6a8   :  { %1482 = vst [vmem:[#allocation2 + $0x8] sm:$0xc] %v1481_v21  ;;  %v1484_v15 = vrot.slane %v1481_v21, 2 }
 0x6aa   :  { %1551 = vmatmul.mubr.f32.vlgmr.msra.gmra.mrb[16].mxu0 %v1484_v15  ;;  %1622 = vmatmul.mubr.f32.vlgmr.msra.gmra.mrb[16].mxu1 %v1484_v15 }
 0x6ab   :  { %2593 = vmatpush1.bf16.msra.mxu0 %v3068_v49  ;;  %2625 = vmatpush1.bf16.msra.mxu1 %v3071_v50 }
 0x6ac   :  { %2595 = vmatprep.subr.bf16.mxu0 %v3073_v51  ;;  %2627 = vmatprep.subr.bf16.mxu1 %v3076_v55 }
 0x6ad   :  { %1739 = vmatprep.mubr.f32.mxu0 %v2958_v0  ;;  %1810 = vmatprep.mubr.f32.mxu1 %v2958_v0 }
 0x6af   :  { %2597 = vmatpush1.bf16.msra.mxu0 %v3079_v61  ;;  %2629 = vmatpush1.bf16.msra.mxu1 %v3083_v62 }
 0x6b0   :  { %2599 = vmatprep.subr.bf16.mxu0 %v3085_v63  ;;  %2631 = vmatprep.subr.bf16.mxu1 %v3088_v4 }
 0x6b3   :  { %2601 = vmatpush1.bf16.msra.mxu0 %v3093_v10  ;;  %2633 = vmatpush1.bf16.msra.mxu1 %v3097_v12 }
 0x6b4   :  { %2603 = vmatprep.subr.bf16.mxu0 %v3099_v13  ;;  %2635 = vmatprep.subr.bf16.mxu1 %v3102_v17 }
 0x6b7   :  { %2605 = vmatpush1.bf16.msra.mxu0 %v3106_v23  ;;  %2637 = vmatpush1.bf16.msra.mxu1 %v3111_v24 }
 0x6b8   :  { %2607 = vmatprep.subr.bf16.mxu0 %v3113_v25  ;;  %2639 = vmatprep.subr.bf16.mxu1 %v3116_v29 }
 0x6bb   :  { %2609 = vmatpush1.bf16.msra.mxu0 %v3119_v35  ;;  %2641 = vmatpush1.bf16.msra.mxu1 %v3123_v36 }
 0x6bc   :  { %2611 = vmatprep.subr.bf16.mxu0 %v3125_v37  ;;  %2643 = vmatprep.subr.bf16.mxu1 %v3128_v43 }
 0x6bf   :  { %2613 = vmatpush1.bf16.msra.mxu0 %v3131_v52  ;;  %2645 = vmatpush1.bf16.msra.mxu1 %v3135_v53  ;;  %v1664_v53 = vrot.slane %v3435_v30, 6  ;;  %v1878_v30 = vld [vmem:[#allocation9 + $0x78] sm:$0xff] }
 0x6c0   :  { %2615 = vmatprep.subr.bf16.mxu0 %v3137_v54  ;;  %2647 = vmatprep.subr.bf16.mxu1 %v3140_v59  ;;  %v2682_v5 = vpack.c.bf16 %v1878_v30, %v1877_v16 }
 0x6c3   :  { %2617 = vmatpush1.bf16.msra.mxu0 %v3143_v6  ;;  %2649 = vmatpush1.bf16.msra.mxu1 %v3147_v7 }
 0x6c4   :  { %2619 = vmatprep.subr.bf16.mxu0 %v3149_v8  ;;  %2651 = vmatprep.subr.bf16.mxu1 %v3152_v14 }
 0x6c7   :  { %2621 = vmatpush1.bf16.msra.mxu0 %v3155_v18  ;;  %2653 = vmatpush1.bf16.msra.mxu1 %v3159_v19 }
 0x6c8   :  { %2655 = vmatprep.subr.bf16.mxu0 %v2654_v34 }
 0x77d   :  { %v1552_v0 = vpop.f32.mrb[16].mxu0  ;;  %v1623_v49 = vpop.f32.mrb[16].mxu1 }
 0x77e   :  { %v1632_v50 = vrot.slane %v1552_v0, 4  ;;  %v1554_v51 = vpop.f32.mrb[17].mxu0  ;;  %v1625_v55 = vpop.f32.mrb[17].mxu1  ;;  %v1634_v17 = vrot.slane %v1623_v49, 4 }
 0x77f   :  { %v1633_v61 = vrot.slane %v1554_v51, 4  ;;  %v1635_v12 = vrot.slane %v1625_v55, 4 }
 0x780   :  { %v1640_v62 = vadd.f32 %v1632_v50, %v3205_v46  ;;  %v1642_v24 = vadd.f32 %v1634_v17, %v3209_v57 }
 0x781   :  { %v1641_v63 = vadd.f32 %v1633_v61, %v3207_v56  ;;  %v1643_v13 = vadd.f32 %v1635_v12, %v3211_v60 }
 0x782   :  { %v2018_v4 = vmul.f32 -1.442695, %v1640_v62 }
 0x783   :  { %v2019_v10 = vmul.f32 -1.442695, %v1641_v63  ;;  %v2020_v23 = vmul.f32 -1.442695, %v1643_v13 }
 0x784   :  { %2792 = vpow2.f32 %v2018_v4 }
 0x785   :  { %2794 = vpow2.f32 %v2019_v10 }
 0x786   :  { %2796 = vpow2.f32 %v2020_v23 }
 0x787   :  { %2798 = vtanh.f32 %v1642_v24 }
 0x78e   :  { %v2793_v25 = vpop.eup %2792 }
 0x78f   :  { %v2795_v29 = vpop.eup %2794  ;;  %v1647_v35 = vadd.f32 1.0, %v2793_v25 }
 0x790   :  { %v1653_v36 = vadd.f32 1.0, %v2795_v29  ;;  %v2797_v37 = vpop.eup %2796 }
 0x791   :  { %2800 = vrcp.f32 %v1647_v35  ;;  %v2799_v43 = vpop.eup %2798  ;;  %v1660_v6 = vadd.f32 1.0, %v2797_v37 }
 0x792   :  { %2802 = vrcp.f32 %v1653_v36 }
 0x793   :  { %2804 = vrcp.f32 %v1660_v6  ;;  %v2024_v6 = vld [vmem:[%s3506_s5] ss:$0 sm:$0xff]  ;;  %s2959_s5 = smov [#allocation11]  }
 0x794   :  { %s1986_s25 = sshll.u32 %s2959_s5, 4  ;;  %s1987_s25 = int_to_ptr.vmem [resolvable:$true] %s1986_s25 }
 0x795   :  { %s2920_s26 = scalar_lea.vmem %s1987_s25, 256  ;;  %p2925_p5 = scmp.lt.s32.totalorder %s1987_s25, %s1987_s25 }
 0x796   :  { %p2921_p4 = scmp.ne.s32.totalorder %s1987_s25, %s2920_s26  ;;  %p2926_p6 = scmp.lt.s32.totalorder %s2920_s26, %s2920_s26 }
 0x798   :  { %p2927_p7 = por %p2926_p6, %p2925_p5 }
 0x79a   :  { %p2928_p8 = pnand %p2927_p7, %p2921_p4 }
 0x79b   :  { %v2801_v52 = vpop.eup %2800 }
 0x79c   :  { %v2803_v54 = vpop.eup %2802  ;;  %v1667_v59 = vmul.f32 %v2801_v52, %v2799_v43 }
 0x79d   :  { %v1666_v7 = vmul.f32 %v2803_v54, %v1664_v53  ;;  %v2805_v14 = vpop.eup %2804 }
 0x79f   :  { %v3475_v8 = vadd.f32 %v1667_v59, %v1666_v7 }
 0x7a1   :  { %2806 = vtanh.f32 %v3475_v8  ;;  %v1853_v35 = vrot.slane %v3475_v8, 6 }
 0x7ab   :  { %v2807_v18 = vpop.eup %2806 }
 0x7ac   :  { %v1670_v19 = vmul.f32 %v2807_v18, %v2805_v14 }
 0x7ae   :  { %1671 = vst [vmem:[#allocation2 + $0x8] sm:$0x30] %v1670_v19  ;;  %v1673_v9 = vrot.slane %v1670_v19, 4 }
 0x7b0   :  { %1740 = vmatmul.mubr.f32.vlgmr.msra.gmra.mrb[18].mxu0 %v1673_v9  ;;  %1811 = vmatmul.mubr.f32.vlgmr.msra.gmra.mrb[18].mxu1 %v1673_v9 }
 0x7b1   :  { %2075 = vmatprep.mubr.f32.mxu0 %v1861_v26  ;;  %2657 = vmatpush3.bf16.msra.mxu0 %v2654_v34 }
 0x7b2   :  { %2659 = vmatprep.subr.bf16.mxu0 %v2658_v44 }
 0x7b5   :  { %2661 = vmatpush3.bf16.msra.mxu0 %v2658_v44 }
 0x7b6   :  { %2663 = vmatprep.subr.bf16.mxu0 %v2662_v39 }
 0x7b9   :  { %2665 = vmatpush3.bf16.msra.mxu0 %v2662_v39 }
 0x7ba   :  { %2667 = vmatprep.subr.bf16.mxu0 %v2666_v1 }
 0x7bd   :  { %2669 = vmatpush3.bf16.msra.mxu0 %v2666_v1 }
 0x7be   :  { %2671 = vmatprep.subr.bf16.mxu0 %v2670_v58 }
 0x7c1   :  { %2673 = vmatpush3.bf16.msra.mxu0 %v2670_v58 }
 0x7c2   :  { %2675 = vmatprep.subr.bf16.mxu0 %v2674_v28 }
 0x7c5   :  { %2677 = vmatpush3.bf16.msra.mxu0 %v2674_v28 }
 0x7c6   :  { %2679 = vmatprep.subr.bf16.mxu0 %v2678_v11 }
 0x7c9   :  { %2681 = vmatpush3.bf16.msra.mxu0 %v2678_v11 }
 0x7ca   :  { %2683 = vmatprep.subr.bf16.mxu0 %v2682_v5 }
 0x7cd   :  { %2685 = vmatpush3.bf16.msra.mxu0 %v2682_v5 }
 0x883   :  { %v1741_v20 = vpop.f32.mrb[18].mxu0  ;;  %v1812_v21 = vpop.f32.mrb[18].mxu1 }
 0x884   :  { %v1821_v15 = vrot.slane %v1741_v20, 2  ;;  %v1743_v0 = vpop.f32.mrb[19].mxu0  ;;  %v1814_v49 = vpop.f32.mrb[19].mxu1  ;;  %v1823_v10 = vrot.slane %v1812_v21, 2 }
 0x885   :  { %v1822_v50 = vrot.slane %v1743_v0, 2  ;;  %v1824_v63 = vrot.slane %v1814_v49, 2 }
 0x886   :  { %v1829_v51 = vadd.f32 %v1821_v15, %v3205_v46  ;;  %v1831_v13 = vadd.f32 %v1823_v10, %v3209_v57 }
 0x887   :  { %v1830_v55 = vadd.f32 %v1822_v50, %v3207_v56  ;;  %v1832_v4 = vadd.f32 %v1824_v63, %v3211_v60 }
 0x888   :  { %v2021_v61 = vmul.f32 -1.442695, %v1829_v51 }
 0x889   :  { %v2022_v62 = vmul.f32 -1.442695, %v1830_v55  ;;  %v2023_v12 = vmul.f32 -1.442695, %v1832_v4 }
 0x88a   :  { %2808 = vpow2.f32 %v2021_v61 }
 0x88b   :  { %2810 = vpow2.f32 %v2022_v62 }
 0x88c   :  { %2812 = vpow2.f32 %v2023_v12 }
 0x88d   :  { %2814 = vtanh.f32 %v1831_v13 }
 0x894   :  { %v2809_v17 = vpop.eup %2808 }
 0x895   :  { %v2811_v23 = vpop.eup %2810  ;;  %v1836_v24 = vadd.f32 1.0, %v2809_v17 }
 0x896   :  { %v1842_v25 = vadd.f32 1.0, %v2811_v23  ;;  %v2813_v46 = vpop.eup %2812 }
 0x897   :  { %2816 = vrcp.f32 %v1836_v24  ;;  %v2815_v56 = vpop.eup %2814  ;;  %v1849_v60 = vadd.f32 1.0, %v2813_v46 }
 0x898   :  { %2818 = vrcp.f32 %v1842_v25 }
 0x899   :  { %2820 = vrcp.f32 %v1849_v60 }
 0x8a1   :  { %v2817_v29 = vpop.eup %2816 }
 0x8a2   :  { %v2819_v36 = vpop.eup %2818  ;;  %v1856_v37 = vmul.f32 %v2817_v29, %v2815_v56 }
 0x8a3   :  { %v1855_v43 = vmul.f32 %v2819_v36, %v1853_v35  ;;  %v2821_v57 = vpop.eup %2820 }
 0x8a5   :  { %v1857_v52 = vadd.f32 %v1856_v37, %v1855_v43 }
 0x8a7   :  { %2822 = vtanh.f32 %v1857_v52 }
 0x8b1   :  { %v2823_v53 = vpop.eup %2822 }
 0x8b2   :  { %v1859_v54 = vmul.f32 %v2823_v53, %v2821_v57 }
 0x8b4   :  { %1860 = vst [vmem:[#allocation2 + $0x8] sm:$0xc0] %v1859_v54 }
 0x8bb   :  { %v1862_v59 = vld [vmem:[#allocation2 + $0x8] sm:$0xff] }
 0x8bc   :  { %2076 = vmatmul.mubr.f32.vlgmr.msra.gmra.mrb[20].mxu0 %v1862_v59 }
 0x98f   :  { %v2077_v7 = vpop.f32.mrb[20].mxu0 }
 0x990   :  { %v1952_v14 = vpop.f32.mrb[21].mxu0  ;;  %v1958_v18 = vadd.f32 %v2077_v7, %v2024_v6 }
 0x991   :  { %v1953_v8 = vadd.f32 %v2024_v6, %v1952_v14 }
 0x993   :  { %1961 = vmax.xlane.f32.xlu0 %v1953_v8 }
 0x997   :  { %1963 = vmax.xlane.f32.xlu0 %v1958_v18 }
 0xa20   :  { %v1962_v19 = vpop.xlane.xlu0 %1961 }
 0xa21   :  { %v1965_v9 = vsub.f32 %v1953_v8, %v1962_v19 }
 0xa23   :  { %v1967_v26 = vmul.f32 1.442695, %v1965_v9 }
 0xa24   :  { %v1964_v32 = vpop.xlane.xlu0 %1963 }
 0xa25   :  { %2824 = vpow2.f32 %v1967_v26  ;;  %v1966_v33 = vsub.f32 %v1958_v18, %v1964_v32 }
 0xa27   :  { %v1969_v34 = vmul.f32 1.442695, %v1966_v33 }
 0xa29   :  { %2826 = vpow2.f32 %v1969_v34 }
 0xa2f   :  { %v2825_v27 = vpop.eup %2824 }
 0xa30   :  { %1971 = vadd.xlane.f32.xlu1 %v2825_v27 }
 0xa33   :  { %v2827_v40 = vpop.eup %2826 }
 0xa34   :  { %1973 = vadd.xlane.f32.xlu1 %v2827_v40 }
 0xabd   :  { %v1972_v44 = vpop.xlane.xlu1 %1971 }
 0xabe   :  { %2828 = vrcp.f32 %v1972_v44 }
 0xac1   :  { %v1974_v47 = vpop.xlane.xlu1 %1973 }
 0xac2   :  { %2830 = vrcp.f32 %v1974_v47 }
 0xac8   :  { %v2829_v38 = vpop.eup %2828 }
 0xac9   :  { %v1977_v39 = vmul.f32 %v2829_v38, %v2825_v27 }
 0xacb   :  { %1979 = vst [vmem:[#allocation11] sm:$0xff] %v1977_v39 }
 0xacc   :  { %v2831_v42 = vpop.eup %2830 }
 0xacd   :  { %v1978_v45 = vmul.f32 %v2831_v42, %v2827_v40 }
 0xacf   :  { %1980 = vst [vmem:[#allocation11 + $0x8] sm:$0xff] %v1978_v45 }
 0xad0   :  { %2931 = shalt.err (!%p2928_p8)
}
 0xad1   :  { %s2932_s29 = scalar_lea.hbm %s3507_s6, 256 }
 0xad2   :  { %p2933_p9 = scmp.ne.s32.totalorder %s3507_s6, %s2932_s29  ;;  %p2936_p10 = scmp.lt.u32.totalorder %s2932_s29, %s3507_s6 }
 0xad4   :  { %p2938_p11 = pnand %p2936_p10, %p2933_p9 }
 0xad6   :  { %2941 = shalt.err (!%p2938_p11)
}
 0xad7   :  { %1992 = dma.vmem_to_hbm [thread:$0]  %s1987_s25, 256, %s3507_s6, [#allocation5], %s2954_s1, %s2954_s1, %s2955_s21  }
 0xad8   :  { %2948 = dma.done.wait [#allocation5], 256  }
 0xad9   :  { %2949 = vsyncadd [#allocation5], 4294967040 }
 0xada   :  { %1996 = vsyncpa [#allocation4], 1 }
 0xadb   :  { %1997 = vsyncpa [#allocation7], 1 }
 0xadc   :  { %1998 = vsyncpa [#allocation10], 1 }
 0xadd   :  { %1999 = vsyncpa [#allocation5], 1 }

</bundles_post_ra>
